<compile_context>
chip_gen: v7x
topology: tpu7x:2x2x1
jax: 0.10.0
libtpu: 0.0.40
codegen_flags: <defaults>
</compile_context>

<pallas_src>
import jax
import jax.numpy as jnp
from jax.experimental import pallas as pl
from jax.experimental.pallas import tpu as pltpu

LANE = 128  # vreg lane width; conv/fc output channels are padded to this


# ----------------------------------------------------------------------------
# Pallas kernels
# ----------------------------------------------------------------------------
def _conv_bn_relu_pool_kernel(p0_ref, p1_ref, p2_ref, p3_ref,
                              w_ref, shift_ref, o_ref):
    """Fused conv(im2col GEMM) + BN(eval) + ReLU + 2x2 maxpool for one row tile.

    p*_ref : (T, K)    bf16  -- flattened patch streams, one per pool-window slot
    w_ref  : (K, 128)  bf16  -- im2col weight, BN scale pre-folded, lane-padded
    shift  : (1, 128)  f32   -- folded BN shift (+ conv bias)
    o_ref  : (T, 128)  bf16  -- pooled output rows (lane-dense store)
    """
    w = w_ref[...]
    shift = shift_ref[...]

    def branch(p_ref):
        acc = jnp.dot(p_ref[...], w, preferred_element_type=jnp.float32)
        return jnp.maximum(acc + shift, 0.0)  # shift + ReLU stays in f32 (VPU)

    y = branch(p0_ref)
    y = jnp.maximum(y, branch(p1_ref))
    y = jnp.maximum(y, branch(p2_ref))
    y = jnp.maximum(y, branch(p3_ref))
    o_ref[...] = y.astype(o_ref.dtype)


def _linear_kernel(x_ref, w_ref, b_ref, o_ref):
    # x: (T, K) bf16, w: (K, Npad) bf16, b: (1, Npad) f32 -> o: (T, Npad) f32
    acc = jnp.dot(x_ref[...], w_ref[...], preferred_element_type=jnp.float32)
    o_ref[...] = acc + b_ref[...]


# ----------------------------------------------------------------------------
# Tiling helpers
# ----------------------------------------------------------------------------
def _cdiv(a, b):
    return -(-a // b)


def _ceil_to(x, m):
    return _cdiv(x, m) * m


def _pick_row_tile(rows, target):
    """Row tile (multiple of 8 sublanes) + padded row count.

    Prefers >=2 grid steps whenever rows allow it (so the 'parallel' grid axis
    keeps both v7x TensorCores busy) and caps tiles near `target` rows."""
    if rows <= 8:
        return 8, 8
    steps = max(_cdiv(rows, target), 2) if rows >= 16 else 1
    tile = _ceil_to(_cdiv(rows, steps), 8)
    padded = _ceil_to(rows, tile)
    return tile, padded


# ----------------------------------------------------------------------------
# Wrappers
# ----------------------------------------------------------------------------
def pooled_im2col_flat(x_nhwc, kh, kw, pad):
    """im2col split into the 4 positions of each 2x2 max-pool window, flattened
    to 2-D GEMM operands.

    Returns 4 arrays of shape (B*Ho*Wo, kh*kw*Cin); stream (dh, dw) holds the
    conv patch at position (2*ph+dh, 2*pw+dw) for pooled row (b, ph, pw).
    Column order is (ki, kj, cin), matching conv_weight_to_matrix."""
    B, H, W, C = x_nhwc.shape
    Ho, Wo = H // 2, W // 2
    xp = jnp.pad(x_nhwc, ((0, 0), (pad, pad), (pad, pad), (0, 0)))
    cols = [xp[:, i:i + H, j:j + W, :] for i in range(kh) for j in range(kw)]
    patches = jnp.stack(cols, axis=3).reshape(B, H, W, kh * kw * C)
    streams = []
    for dh in range(2):
        for dw in range(2):
            streams.append(
                patches[:, dh::2, dw::2, :].reshape(B * Ho * Wo, kh * kw * C))
    return streams


def conv_bn_relu_pool(x_nhwc, w_pad, shift_pad, cout, *, ksize=5, pad=2,
                      target_rows=2048):
    """Fused Conv2d(k, pad) + BatchNorm(eval) + ReLU + MaxPool2d(2) in one pallas_call."""
    B, H, W, _ = x_nhwc.shape
    Ho, Wo = H // 2, W // 2
    P = Ho * Wo
    K = w_pad.shape[0]
    rows = B * P

    # JAX glue: patch extraction as pure bf16 indexing, flattened to GEMM rows.
    streams = pooled_im2col_flat(x_nhwc.astype(jnp.bfloat16), ksize, ksize, pad)
    tile, padded = _pick_row_tile(rows, target_rows)
    if padded != rows:
        streams = [jnp.pad(s, ((0, padded - rows), (0, 0))) for s in streams]

    patch_spec = pl.BlockSpec((tile, K), lambda t: (t, 0))
    out = pl.pallas_call(
        _conv_bn_relu_pool_kernel,
        grid=(padded // tile,),
        out_shape=jax.ShapeDtypeStruct((padded, LANE), jnp.bfloat16),
        in_specs=[patch_spec, patch_spec, patch_spec, patch_spec,
                  pl.BlockSpec((K, LANE), lambda t: (0, 0)),
                  pl.BlockSpec((1, LANE), lambda t: (0, 0))],
        out_specs=pl.BlockSpec((tile, LANE), lambda t: (t, 0)),
        compiler_params=pltpu.CompilerParams(dimension_semantics=("parallel",)),
    )(*streams, w_pad, shift_pad)

    # Drop row padding and lane padding so the next layer's K stays the true size.
    return out[:rows, :cout].reshape(B, Ho, Wo, cout)


def linear(x, w_pad, bias_pad, *, target_rows=2048):
    """x @ w + b with lane-padded N; rows cdiv-padded/tiled for dense stores."""
    M, K = x.shape
    N = w_pad.shape[1]
    tile, padded = _pick_row_tile(M, target_rows)
    xp = x.astype(jnp.bfloat16)
    if padded != M:
        xp = jnp.pad(xp, ((0, padded - M), (0, 0)))
    out = pl.pallas_call(
        _linear_kernel,
        grid=(padded // tile,),
        out_shape=jax.ShapeDtypeStruct((padded, N), jnp.float32),
        in_specs=[pl.BlockSpec((tile, K), lambda i: (i, 0)),
                  pl.BlockSpec((K, N), lambda i: (0, 0)),
                  pl.BlockSpec((1, N), lambda i: (0, 0))],
        out_specs=pl.BlockSpec((tile, N), lambda i: (i, 0)),
        compiler_params=pltpu.CompilerParams(dimension_semantics=("parallel",)),
    )(xp, w_pad.astype(jnp.bfloat16), bias_pad.astype(jnp.float32))
    return out[:M]


# ----------------------------------------------------------------------------
# Parameters: init + one-time prep (folding / permutation / lane padding)
# ----------------------------------------------------------------------------
def conv_weight_to_matrix(w_oihw):
    # PyTorch conv weight (Cout, Cin, kh, kw) -> (kh*kw*Cin, Cout),
    # matching the im2col column order (ki, kj, cin).
    cout, cin, kh, kw = w_oihw.shape
    return jnp.transpose(w_oihw, (2, 3, 1, 0)).reshape(kh * kw * cin, cout)


def fold_conv_bn_into_weight(w_oihw, bias, gamma, beta, mean, var, eps=1e-5):
    """BN(conv(x)+b) = conv_scaled(x) + shift, with the scale folded into the
    weight (in f32, before the bf16 cast) and both lane-padded to 128."""
    cout = w_oihw.shape[0]
    scale = gamma / jnp.sqrt(var + eps)
    shift = beta + (bias - mean) * scale
    w_mat = conv_weight_to_matrix(w_oihw) * scale[None, :]      # f32 fold
    K = w_mat.shape[0]
    w_lane = jnp.zeros((K, LANE), jnp.float32).at[:, :cout].set(w_mat)
    shift_lane = jnp.zeros((1, LANE), jnp.float32).at[0, :cout].set(shift)
    return w_lane.astype(jnp.bfloat16), shift_lane, cout


def init_params(key):
    ks = jax.random.split(key, 16)
    p = {}
    # layer1: Conv2d(1, 16, 5, padding=2) + BatchNorm2d(16)
    p["w1"] = jax.random.normal(ks[0], (16, 1, 5, 5), jnp.float32) * 0.1
    p["b1"] = jax.random.normal(ks[1], (16,), jnp.float32) * 0.05
    p["g1"] = 1.0 + 0.1 * jax.random.normal(ks[2], (16,), jnp.float32)
    p["beta1"] = 0.05 * jax.random.normal(ks[3], (16,), jnp.float32)
    p["mean1"] = 0.02 * jax.random.normal(ks[4], (16,), jnp.float32)
    p["var1"] = 1.0 + 0.1 * jnp.abs(jax.random.normal(ks[5], (16,), jnp.float32))
    # layer2: Conv2d(16, 32, 5, padding=2) + BatchNorm2d(32)
    p["w2"] = jax.random.normal(ks[6], (32, 16, 5, 5), jnp.float32) * 0.05
    p["b2"] = jax.random.normal(ks[7], (32,), jnp.float32) * 0.05
    p["g2"] = 1.0 + 0.1 * jax.random.normal(ks[8], (32,), jnp.float32)
    p["beta2"] = 0.05 * jax.random.normal(ks[9], (32,), jnp.float32)
    p["mean2"] = 0.02 * jax.random.normal(ks[10], (32,), jnp.float32)
    p["var2"] = 1.0 + 0.1 * jnp.abs(jax.random.normal(ks[11], (32,), jnp.float32))
    # fc1: Linear(32*7*7, 27)  (PyTorch weight layout (out, in), in ordered (c, h, w))
    p["wfc"] = jax.random.normal(ks[12], (27, 32 * 7 * 7), jnp.float32) * 0.02
    p["bfc"] = jax.random.normal(ks[13], (27,), jnp.float32) * 0.05
    return p


def prepare_params(p, eps=1e-5):
    """One-time prep: fold BN scale into conv weights, lane-pad channels,
    permute fc1 weight to NHWC-flat column order and lane-pad its N."""
    prep = {}
    prep["w1"], prep["shift1"], prep["c1"] = fold_conv_bn_into_weight(
        p["w1"], p["b1"], p["g1"], p["beta1"], p["mean1"], p["var1"], eps)
    prep["w2"], prep["shift2"], prep["c2"] = fold_conv_bn_into_weight(
        p["w2"], p["b2"], p["g2"], p["beta2"], p["mean2"], p["var2"], eps)
    n_out = p["wfc"].shape[0]
    # (27, 32*7*7) columns ordered (c, h, w) -> (7*7*32, 27) ordered (h, w, c)
    wfc_nhwc = jnp.transpose(p["wfc"].reshape(n_out, 32, 7, 7),
                             (2, 3, 1, 0)).reshape(7 * 7 * 32, n_out)
    prep["wfc"] = jnp.pad(wfc_nhwc, ((0, 0), (0, LANE - n_out))).astype(jnp.bfloat16)
    prep["bfc"] = jnp.pad(p["bfc"], (0, LANE - n_out)).reshape(1, LANE)
    prep["n_out"] = n_out
    return prep


# ----------------------------------------------------------------------------
# Forward pass
# ----------------------------------------------------------------------------
def nn_forward(x_nchw, prep):
    x = jnp.transpose(x_nchw, (0, 2, 3, 1)).astype(jnp.bfloat16)  # NCHW -> NHWC
    B = x.shape[0]

    # layer1: conv(1->16, k5, pad2) + BN + ReLU + maxpool(2)   -> (B, 14, 14, 16)
    y = conv_bn_relu_pool(x, prep["w1"], prep["shift1"], prep["c1"])

    # layer2: conv(16->32, k5, pad2) + BN + ReLU + maxpool(2)  -> (B, 7, 7, 32)
    y = conv_bn_relu_pool(y, prep["w2"], prep["shift2"], prep["c2"])

    # fc1 on the NHWC-flat activation (weight pre-permuted, output lane-padded)
    flat = y.reshape(B, 7 * 7 * 32)
    out = linear(flat, prep["wfc"], prep["bfc"])
    return out[:, :prep["n_out"]]                                 # (B, 27)


if __name__ == "__main__":
    key = jax.random.PRNGKey(0)
    kx, kp = jax.random.split(key)
    params = init_params(kp)
    prep = prepare_params(params)

    # Module implies 28x28 single-channel input (32*7*7 fc after two /2 pools).
    x = jax.random.normal(kx, (2, 1, 28, 28), jnp.float32)

    fwd = jax.jit(lambda inp: nn_forward(inp, prep))
    out = jax.block_until_ready(fwd(x))
    assert out.shape == (2, 27), out.shape
    assert bool(jnp.all(jnp.isfinite(out)))
    print("KERNEL_OK")
</pallas_src>

<mosaic_0001>
module attributes {stable_mosaic.version = 11 : i64} {
  func.func @_conv_bn_relu_pool_kernel(%arg0: i32, %arg1: memref<200x25xbf16, #tpu.memory_space<vmem>>, %arg2: memref<200x25xbf16, #tpu.memory_space<vmem>>, %arg3: memref<200x25xbf16, #tpu.memory_space<vmem>>, %arg4: memref<200x25xbf16, #tpu.memory_space<vmem>>, %arg5: memref<25x128xbf16, #tpu.memory_space<vmem>>, %arg6: memref<1x128xf32, #tpu.memory_space<vmem>>, %arg7: memref<200x128xbf16, #tpu.memory_space<vmem>>) attributes {dimension_semantics = [#tpu.dimension_semantics<parallel>], iteration_bounds = array<i64: 2>, scalar_prefetch = 0 : i64, scratch_operands = 0 : i64, tpu.core_type = #tpu.core_type<tc>, window_params = [{transform_indices = @transform_0, window_bounds = array<i64: 200, 25>}, {transform_indices = @transform_1, window_bounds = array<i64: 200, 25>}, {transform_indices = @transform_2, window_bounds = array<i64: 200, 25>}, {transform_indices = @transform_3, window_bounds = array<i64: 200, 25>}, {pipeline_mode = #tpu.pipeline_mode<synchronous>, transform_indices = @transform_4, window_bounds = array<i64: 25, 128>}, {pipeline_mode = #tpu.pipeline_mode<synchronous>, transform_indices = @transform_5, window_bounds = array<i64: 1, 128>}, {transform_indices = @transform_6, window_bounds = array<i64: 200, 128>}]} {
    %c0 = arith.constant 0 : index
    %c0_0 = arith.constant 0 : index
    %0 = vector.load %arg5[%c0, %c0_0] : memref<25x128xbf16, #tpu.memory_space<vmem>>, vector<25x128xbf16>
    %c0_1 = arith.constant 0 : index
    %c0_2 = arith.constant 0 : index
    %1 = vector.load %arg6[%c0_1, %c0_2] : memref<1x128xf32, #tpu.memory_space<vmem>>, vector<1x128xf32>
    %c0_3 = arith.constant 0 : index
    %c0_4 = arith.constant 0 : index
    %2 = vector.load %arg1[%c0_3, %c0_4] : memref<200x25xbf16, #tpu.memory_space<vmem>>, vector<200x25xbf16>
    %cst = arith.constant dense<0.000000e+00> : vector<200x128xf32>
    %3 = tpu.matmul %2, %0, %cst {dimension_numbers = #tpu.dot_dimension_numbers<[1], [0], [0], [1], [0, 0, 1, 1], [], []>} : vector<200x25xbf16>, vector<25x128xbf16>, vector<200x128xf32> -> vector<200x128xf32>
    %4 = vector.broadcast %1 : vector<1x128xf32> to vector<200x128xf32>
    %5 = arith.addf %3, %4 : vector<200x128xf32>
    %cst_5 = arith.constant 0.000000e+00 : f32
    %6 = vector.broadcast %cst_5 : f32 to vector<200x128xf32>
    %7 = arith.maximumf %5, %6 : vector<200x128xf32>
    %c0_6 = arith.constant 0 : index
    %c0_7 = arith.constant 0 : index
    %8 = vector.load %arg2[%c0_6, %c0_7] : memref<200x25xbf16, #tpu.memory_space<vmem>>, vector<200x25xbf16>
    %cst_8 = arith.constant dense<0.000000e+00> : vector<200x128xf32>
    %9 = tpu.matmul %8, %0, %cst_8 {dimension_numbers = #tpu.dot_dimension_numbers<[1], [0], [0], [1], [0, 0, 1, 1], [], []>} : vector<200x25xbf16>, vector<25x128xbf16>, vector<200x128xf32> -> vector<200x128xf32>
    %10 = vector.broadcast %1 : vector<1x128xf32> to vector<200x128xf32>
    %11 = arith.addf %9, %10 : vector<200x128xf32>
    %cst_9 = arith.constant 0.000000e+00 : f32
    %12 = vector.broadcast %cst_9 : f32 to vector<200x128xf32>
    %13 = arith.maximumf %11, %12 : vector<200x128xf32>
    %14 = arith.maximumf %7, %13 : vector<200x128xf32>
    %c0_10 = arith.constant 0 : index
    %c0_11 = arith.constant 0 : index
    %15 = vector.load %arg3[%c0_10, %c0_11] : memref<200x25xbf16, #tpu.memory_space<vmem>>, vector<200x25xbf16>
    %cst_12 = arith.constant dense<0.000000e+00> : vector<200x128xf32>
    %16 = tpu.matmul %15, %0, %cst_12 {dimension_numbers = #tpu.dot_dimension_numbers<[1], [0], [0], [1], [0, 0, 1, 1], [], []>} : vector<200x25xbf16>, vector<25x128xbf16>, vector<200x128xf32> -> vector<200x128xf32>
    %17 = vector.broadcast %1 : vector<1x128xf32> to vector<200x128xf32>
    %18 = arith.addf %16, %17 : vector<200x128xf32>
    %cst_13 = arith.constant 0.000000e+00 : f32
    %19 = vector.broadcast %cst_13 : f32 to vector<200x128xf32>
    %20 = arith.maximumf %18, %19 : vector<200x128xf32>
    %21 = arith.maximumf %14, %20 : vector<200x128xf32>
    %c0_14 = arith.constant 0 : index
    %c0_15 = arith.constant 0 : index
    %22 = vector.load %arg4[%c0_14, %c0_15] : memref<200x25xbf16, #tpu.memory_space<vmem>>, vector<200x25xbf16>
    %cst_16 = arith.constant dense<0.000000e+00> : vector<200x128xf32>
    %23 = tpu.matmul %22, %0, %cst_16 {dimension_numbers = #tpu.dot_dimension_numbers<[1], [0], [0], [1], [0, 0, 1, 1], [], []>} : vector<200x25xbf16>, vector<25x128xbf16>, vector<200x128xf32> -> vector<200x128xf32>
    %24 = vector.broadcast %1 : vector<1x128xf32> to vector<200x128xf32>
    %25 = arith.addf %23, %24 : vector<200x128xf32>
    %cst_17 = arith.constant 0.000000e+00 : f32
    %26 = vector.broadcast %cst_17 : f32 to vector<200x128xf32>
    %27 = arith.maximumf %25, %26 : vector<200x128xf32>
    %28 = arith.maximumf %21, %27 : vector<200x128xf32>
    %29 = arith.truncf %28 : vector<200x128xf32> to vector<200x128xbf16>
    %c0_18 = arith.constant 0 : index
    %c0_19 = arith.constant 0 : index
    %30 = vector.load %arg7[%c0_18, %c0_19] : memref<200x128xbf16, #tpu.memory_space<vmem>>, vector<200x128xbf16>
    tpu.vector_store %arg7[%c0_18, %c0_19], %29 {strides = array<i32>} : memref<200x128xbf16, #tpu.memory_space<vmem>>, vector<200x128xbf16>,
    return
  }
  func.func @transform_0(%arg0: i32) -> (i32, i32) {
    %c0_i32 = arith.constant 0 : i32
    %c0_i32_0 = arith.constant 0 : i32
    return %arg0, %c0_i32 : i32, i32
  }
  func.func @transform_1(%arg0: i32) -> (i32, i32) {
    %c0_i32 = arith.constant 0 : i32
    %c0_i32_0 = arith.constant 0 : i32
    return %arg0, %c0_i32 : i32, i32
  }
  func.func @transform_2(%arg0: i32) -> (i32, i32) {
    %c0_i32 = arith.constant 0 : i32
    %c0_i32_0 = arith.constant 0 : i32
    return %arg0, %c0_i32 : i32, i32
  }
  func.func @transform_3(%arg0: i32) -> (i32, i32) {
    %c0_i32 = arith.constant 0 : i32
    %c0_i32_0 = arith.constant 0 : i32
    return %arg0, %c0_i32 : i32, i32
  }
  func.func @transform_4(%arg0: i32) -> (i32, i32) {
    %c0_i32 = arith.constant 0 : i32
    %c0_i32_0 = arith.constant 0 : i32
    %c0_i32_1 = arith.constant 0 : i32
    return %c0_i32, %c0_i32_0 : i32, i32
  }
  func.func @transform_5(%arg0: i32) -> (i32, i32) {
    %c0_i32 = arith.constant 0 : i32
    %c0_i32_0 = arith.constant 0 : i32
    %c0_i32_1 = arith.constant 0 : i32
    return %c0_i32, %c0_i32_0 : i32, i32
  }
  func.func @transform_6(%arg0: i32) -> (i32, i32) {
    %c0_i32 = arith.constant 0 : i32
    %c0_i32_0 = arith.constant 0 : i32
    return %arg0, %c0_i32 : i32, i32
  }
}

module attributes {stable_mosaic.version = 11 : i64} {
  func.func @_conv_bn_relu_pool_kernel(%arg0: i32, %arg1: memref<56x400xbf16, #tpu.memory_space<vmem>>, %arg2: memref<56x400xbf16, #tpu.memory_space<vmem>>, %arg3: memref<56x400xbf16, #tpu.memory_space<vmem>>, %arg4: memref<56x400xbf16, #tpu.memory_space<vmem>>, %arg5: memref<400x128xbf16, #tpu.memory_space<vmem>>, %arg6: memref<1x128xf32, #tpu.memory_space<vmem>>, %arg7: memref<56x128xbf16, #tpu.memory_space<vmem>>) attributes {dimension_semantics = [#tpu.dimension_semantics<parallel>], iteration_bounds = array<i64: 2>, scalar_prefetch = 0 : i64, scratch_operands = 0 : i64, tpu.core_type = #tpu.core_type<tc>, window_params = [{transform_indices = @transform_0, window_bounds = array<i64: 56, 400>}, {transform_indices = @transform_1, window_bounds = array<i64: 56, 400>}, {transform_indices = @transform_2, window_bounds = array<i64: 56, 400>}, {transform_indices = @transform_3, window_bounds = array<i64: 56, 400>}, {pipeline_mode = #tpu.pipeline_mode<synchronous>, transform_indices = @transform_4, window_bounds = array<i64: 400, 128>}, {pipeline_mode = #tpu.pipeline_mode<synchronous>, transform_indices = @transform_5, window_bounds = array<i64: 1, 128>}, {transform_indices = @transform_6, window_bounds = array<i64: 56, 128>}]} {
    %c0 = arith.constant 0 : index
    %c0_0 = arith.constant 0 : index
    %0 = vector.load %arg5[%c0, %c0_0] : memref<400x128xbf16, #tpu.memory_space<vmem>>, vector<400x128xbf16>
    %c0_1 = arith.constant 0 : index
    %c0_2 = arith.constant 0 : index
    %1 = vector.load %arg6[%c0_1, %c0_2] : memref<1x128xf32, #tpu.memory_space<vmem>>, vector<1x128xf32>
    %c0_3 = arith.constant 0 : index
    %c0_4 = arith.constant 0 : index
    %2 = vector.load %arg1[%c0_3, %c0_4] : memref<56x400xbf16, #tpu.memory_space<vmem>>, vector<56x400xbf16>
    %cst = arith.constant dense<0.000000e+00> : vector<56x128xf32>
    %3 = tpu.matmul %2, %0, %cst {dimension_numbers = #tpu.dot_dimension_numbers<[1], [0], [0], [1], [0, 0, 1, 1], [], []>} : vector<56x400xbf16>, vector<400x128xbf16>, vector<56x128xf32> -> vector<56x128xf32>
    %4 = vector.broadcast %1 : vector<1x128xf32> to vector<56x128xf32>
    %5 = arith.addf %3, %4 : vector<56x128xf32>
    %cst_5 = arith.constant 0.000000e+00 : f32
    %6 = vector.broadcast %cst_5 : f32 to vector<56x128xf32>
    %7 = arith.maximumf %5, %6 : vector<56x128xf32>
    %c0_6 = arith.constant 0 : index
    %c0_7 = arith.constant 0 : index
    %8 = vector.load %arg2[%c0_6, %c0_7] : memref<56x400xbf16, #tpu.memory_space<vmem>>, vector<56x400xbf16>
    %cst_8 = arith.constant dense<0.000000e+00> : vector<56x128xf32>
    %9 = tpu.matmul %8, %0, %cst_8 {dimension_numbers = #tpu.dot_dimension_numbers<[1], [0], [0], [1], [0, 0, 1, 1], [], []>} : vector<56x400xbf16>, vector<400x128xbf16>, vector<56x128xf32> -> vector<56x128xf32>
    %10 = vector.broadcast %1 : vector<1x128xf32> to vector<56x128xf32>
    %11 = arith.addf %9, %10 : vector<56x128xf32>
    %cst_9 = arith.constant 0.000000e+00 : f32
    %12 = vector.broadcast %cst_9 : f32 to vector<56x128xf32>
    %13 = arith.maximumf %11, %12 : vector<56x128xf32>
    %14 = arith.maximumf %7, %13 : vector<56x128xf32>
    %c0_10 = arith.constant 0 : index
    %c0_11 = arith.constant 0 : index
    %15 = vector.load %arg3[%c0_10, %c0_11] : memref<56x400xbf16, #tpu.memory_space<vmem>>, vector<56x400xbf16>
    %cst_12 = arith.constant dense<0.000000e+00> : vector<56x128xf32>
    %16 = tpu.matmul %15, %0, %cst_12 {dimension_numbers = #tpu.dot_dimension_numbers<[1], [0], [0], [1], [0, 0, 1, 1], [], []>} : vector<56x400xbf16>, vector<400x128xbf16>, vector<56x128xf32> -> vector<56x128xf32>
    %17 = vector.broadcast %1 : vector<1x128xf32> to vector<56x128xf32>
    %18 = arith.addf %16, %17 : vector<56x128xf32>
    %cst_13 = arith.constant 0.000000e+00 : f32
    %19 = vector.broadcast %cst_13 : f32 to vector<56x128xf32>
    %20 = arith.maximumf %18, %19 : vector<56x128xf32>
    %21 = arith.maximumf %14, %20 : vector<56x128xf32>
    %c0_14 = arith.constant 0 : index
    %c0_15 = arith.constant 0 : index
    %22 = vector.load %arg4[%c0_14, %c0_15] : memref<56x400xbf16, #tpu.memory_space<vmem>>, vector<56x400xbf16>
    %cst_16 = arith.constant dense<0.000000e+00> : vector<56x128xf32>
    %23 = tpu.matmul %22, %0, %cst_16 {dimension_numbers = #tpu.dot_dimension_numbers<[1], [0], [0], [1], [0, 0, 1, 1], [], []>} : vector<56x400xbf16>, vector<400x128xbf16>, vector<56x128xf32> -> vector<56x128xf32>
    %24 = vector.broadcast %1 : vector<1x128xf32> to vector<56x128xf32>
    %25 = arith.addf %23, %24 : vector<56x128xf32>
    %cst_17 = arith.constant 0.000000e+00 : f32
    %26 = vector.broadcast %cst_17 : f32 to vector<56x128xf32>
    %27 = arith.maximumf %25, %26 : vector<56x128xf32>
    %28 = arith.maximumf %21, %27 : vector<56x128xf32>
    %29 = arith.truncf %28 : vector<56x128xf32> to vector<56x128xbf16>
    %c0_18 = arith.constant 0 : index
    %c0_19 = arith.constant 0 : index
    %30 = vector.load %arg7[%c0_18, %c0_19] : memref<56x128xbf16, #tpu.memory_space<vmem>>, vector<56x128xbf16>
    tpu.vector_store %arg7[%c0_18, %c0_19], %29 {strides = array<i32>} : memref<56x128xbf16, #tpu.memory_space<vmem>>, vector<56x128xbf16>,
    return
  }
  func.func @transform_0(%arg0: i32) -> (i32, i32) {
    %c0_i32 = arith.constant 0 : i32
    %c0_i32_0 = arith.constant 0 : i32
    return %arg0, %c0_i32 : i32, i32
  }
  func.func @transform_1(%arg0: i32) -> (i32, i32) {
    %c0_i32 = arith.constant 0 : i32
    %c0_i32_0 = arith.constant 0 : i32
    return %arg0, %c0_i32 : i32, i32
  }
  func.func @transform_2(%arg0: i32) -> (i32, i32) {
    %c0_i32 = arith.constant 0 : i32
    %c0_i32_0 = arith.constant 0 : i32
    return %arg0, %c0_i32 : i32, i32
  }
  func.func @transform_3(%arg0: i32) -> (i32, i32) {
    %c0_i32 = arith.constant 0 : i32
    %c0_i32_0 = arith.constant 0 : i32
    return %arg0, %c0_i32 : i32, i32
  }
  func.func @transform_4(%arg0: i32) -> (i32, i32) {
    %c0_i32 = arith.constant 0 : i32
    %c0_i32_0 = arith.constant 0 : i32
    %c0_i32_1 = arith.constant 0 : i32
    return %c0_i32, %c0_i32_0 : i32, i32
  }
  func.func @transform_5(%arg0: i32) -> (i32, i32) {
    %c0_i32 = arith.constant 0 : i32
    %c0_i32_0 = arith.constant 0 : i32
    %c0_i32_1 = arith.constant 0 : i32
    return %c0_i32, %c0_i32_0 : i32, i32
  }
  func.func @transform_6(%arg0: i32) -> (i32, i32) {
    %c0_i32 = arith.constant 0 : i32
    %c0_i32_0 = arith.constant 0 : i32
    return %arg0, %c0_i32 : i32, i32
  }
}

module attributes {stable_mosaic.version = 11 : i64} {
  func.func @_linear_kernel(%arg0: i32, %arg1: memref<8x1568xbf16, #tpu.memory_space<vmem>>, %arg2: memref<1568x128xbf16, #tpu.memory_space<vmem>>, %arg3: memref<1x128xf32, #tpu.memory_space<vmem>>, %arg4: memref<8x128xf32, #tpu.memory_space<vmem>>) attributes {dimension_semantics = [#tpu.dimension_semantics<parallel>], iteration_bounds = array<i64: 1>, scalar_prefetch = 0 : i64, scratch_operands = 0 : i64, tpu.core_type = #tpu.core_type<tc>, window_params = [{transform_indices = @transform_0, window_bounds = array<i64: 8, 1568>}, {pipeline_mode = #tpu.pipeline_mode<synchronous>, transform_indices = @transform_1, window_bounds = array<i64: 1568, 128>}, {pipeline_mode = #tpu.pipeline_mode<synchronous>, transform_indices = @transform_2, window_bounds = array<i64: 1, 128>}, {transform_indices = @transform_3, window_bounds = array<i64: 8, 128>}]} {
    %c0 = arith.constant 0 : index
    %c0_0 = arith.constant 0 : index
    %0 = vector.load %arg1[%c0, %c0_0] : memref<8x1568xbf16, #tpu.memory_space<vmem>>, vector<8x1568xbf16>
    %c0_1 = arith.constant 0 : index
    %c0_2 = arith.constant 0 : index
    %1 = vector.load %arg2[%c0_1, %c0_2] : memref<1568x128xbf16, #tpu.memory_space<vmem>>, vector<1568x128xbf16>
    %cst = arith.constant dense<0.000000e+00> : vector<8x128xf32>
    %2 = tpu.matmul %0, %1, %cst {dimension_numbers = #tpu.dot_dimension_numbers<[1], [0], [0], [1], [0, 0, 1, 1], [], []>} : vector<8x1568xbf16>, vector<1568x128xbf16>, vector<8x128xf32> -> vector<8x128xf32>
    %c0_3 = arith.constant 0 : index
    %c0_4 = arith.constant 0 : index
    %3 = vector.load %arg3[%c0_3, %c0_4] : memref<1x128xf32, #tpu.memory_space<vmem>>, vector<1x128xf32>
    %4 = vector.broadcast %3 : vector<1x128xf32> to vector<8x128xf32>
    %5 = arith.addf %2, %4 : vector<8x128xf32>
    %c0_5 = arith.constant 0 : index
    %c0_6 = arith.constant 0 : index
    %6 = vector.load %arg4[%c0_5, %c0_6] : memref<8x128xf32, #tpu.memory_space<vmem>>, vector<8x128xf32>
    tpu.vector_store %arg4[%c0_5, %c0_6], %5 {strides = array<i32>} : memref<8x128xf32, #tpu.memory_space<vmem>>, vector<8x128xf32>,
    return
  }
  func.func @transform_0(%arg0: i32) -> (i32, i32) {
    %c0_i32 = arith.constant 0 : i32
    %c0_i32_0 = arith.constant 0 : i32
    return %arg0, %c0_i32 : i32, i32
  }
  func.func @transform_1(%arg0: i32) -> (i32, i32) {
    %c0_i32 = arith.constant 0 : i32
    %c0_i32_0 = arith.constant 0 : i32
    %c0_i32_1 = arith.constant 0 : i32
    return %c0_i32, %c0_i32_0 : i32, i32
  }
  func.func @transform_2(%arg0: i32) -> (i32, i32) {
    %c0_i32 = arith.constant 0 : i32
    %c0_i32_0 = arith.constant 0 : i32
    %c0_i32_1 = arith.constant 0 : i32
    return %c0_i32, %c0_i32_0 : i32, i32
  }
  func.func @transform_3(%arg0: i32) -> (i32, i32) {
    %c0_i32 = arith.constant 0 : i32
    %c0_i32_0 = arith.constant 0 : i32
    return %arg0, %c0_i32 : i32, i32
  }
}

</mosaic_0001>

<bundles_post_ra>
// kernel: _lambda_.3
= control target key start
LH: loop header
LB: loop body
LE: loop exit
PB: predicated region body
PF: predicated region fallthrough
CT: control target
= control target key end

     0   :  { %s2432_s21 = smov 0   ;;  %s2890_s0 = inlined_call_operand.vmem [shape: bf16[400,25], index: 0, kind: input, shape index: {}]   ;;  %s2891_s1 = inlined_call_operand.vmem [shape: bf16[400,25], index: 1, kind: input, shape index: {}]   ;;  %s2892_s2 = inlined_call_operand.vmem [shape: bf16[400,25], index: 2, kind: input, shape index: {}]   ;;  %s2893_s3 = inlined_call_operand.vmem [shape: bf16[400,25], index: 3, kind: input, shape index: {}]   ;;  %s2894_s4 = inlined_call_operand.vmem [shape: bf16[25,128], index: 4, kind: input, shape index: {}]   ;;  %s2895_s5 = inlined_call_operand.vmem [shape: f32[1,128], index: 5, kind: input, shape index: {}]   ;;  %s2896_s6 = inlined_call_operand.vmem [shape: bf16[400,128], index: 6, kind: output, shape index: {}]  }
   0x1 LB: > { %s1797_s22 = sadd.s32 4294967295, %s2392_s21   ;;  %p1801_p0 = scmp.ge.s32.totalorder %s2392_s21, 1  ;;  %s2392_s21 = sphi %s2432_s21, %s16_s21  }
   0x2   : > { %p246_p1 = scmp.lt.s32.totalorder %s2392_s21, 3 }
   0x4   : > { %p247_p2 = pnand %p1801_p0, %p246_p1 }
   0x5   : > { %v2332_v0 = vld [vmem:[%s2894_s4] sm:$0xff] (!%p247_p2)   ;;  %v2394_v1 = vmov (!%p247_p2), 0.0   ;;  %v2333_v2 = vld [vmem:[%s2894_s4 + $0x8] sm:$0x1f] (!%p247_p2)   ;;  %vm472_vm0 = vcmask (!%p247_p2), 1043456   ;;  %vm473_vm1 = vcmask (!%p247_p2), 1044480  }
   0x6   : > { %250 = sbr.rel (%p247_p2) target bundleno = 440 (0x1b8), region = 44  ;;  %2097 = vmatprep.subr.bf16.mxu0 (!%p247_p2), %v2394_v1  ;;  %2153 = vmatprep.subr.bf16.mxu1 (!%p247_p2), %v2394_v1  ;;  %v2395_v3 = vmov (!%p247_p2), 65535   ;;  %vm2396_vm2 = vmmov (!%p247_p2), 0   ;;  %vm432_vm3 = vcmask (!%p247_p2), 203776   ;;  %v2691_v59 = vld [vmem:[%s2895_s5] ss:$0 sm:$0xff] (!%p247_p2) }
   0x7   : > { %2098 = vmatpush3.bf16.msra.mxu0 (!%p247_p2), %v2332_v0  ;;  %2154 = vmatpush3.bf16.msra.mxu1 (!%p247_p2), %v2332_v0  ;;  %s291_s27 = smul.u32 (!%p247_p2), 25, %s1797_s22  ;;  %v474_v4 = vsel (!%p247_p2), %vm472_vm0, 4294967295, %v2395_v3 }
   0x8   : > { %2099 = vmatprep.subr.bf16.mxu0 (!%p247_p2), %v2394_v1  ;;  %2155 = vmatprep.subr.bf16.mxu1 (!%p247_p2), %v2394_v1  ;;  %v475_v5 = vsel (!%p247_p2), %vm473_vm1, %v474_v4, 0 }
   0x9   : > { %2101 = vmatprep.mubr.msk.bf16.mxu0 (!%p247_p2), %vm2396_vm2, %v2394_v1  ;;  %2157 = vmatprep.mubr.msk.bf16.mxu1 (!%p247_p2), %vm2396_vm2, %v2394_v1  ;;  %p292_p3 = scmp.lt.s32.totalorder (!%p247_p2), %s291_s27, 49  ;;  %v477_v6 = vand.u32 (!%p247_p2), %v2333_v2, %v475_v5 }
   0xb   : > { %2100 = vmatpush3.bf16.msra.mxu0 (!%p247_p2), %v477_v6  ;;  %2156 = vmatpush3.bf16.msra.mxu1 (!%p247_p2), %v477_v6 }
   0xc   : > { %2209 = vmatprep.subr.bf16.mxu0 (!%p247_p2), %v2394_v1  ;;  %2265 = vmatprep.subr.bf16.mxu1 (!%p247_p2), %v2394_v1 }
   0xd   : > { %s2898_s27 = smov (!%p292_p3, %s291_s27), 49 }
   0xe   : > { %s2455_s28 = sshll.u32 %s2898_s27, 2 }
   0xf   : > { %s2462_s7 = scalar_lea.vmem %s2890_s0, %s2455_s28  ;;  %s2468_s10 = scalar_lea.vmem %s2891_s1, %s2455_s28 }
  0x10   : > { %v2334_v7 = vld [vmem:[%s2462_s7] sm:$0xff]   ;;  %v2336_v9 = vld [vmem:[%s2462_s7 + $0x8] sm:$0xff]   ;;  %v2338_v11 = vld [vmem:[%s2462_s7 + $0x10] sm:$0xff]   ;;  %s2502_s13 = scalar_lea.vmem %s2892_s2, %s2455_s28  ;;  %s2508_s16 = scalar_lea.vmem %s2893_s3, %s2455_s28 }
  0x11   : > { %v2335_v8 = vld [vmem:[%s2468_s10] sm:$0xff]   ;;  %2102 = vmatmul.mubr.msk.bf16.vlgmr.msra.gmra.mrb[0].mxu0 %vm432_vm3, %v2334_v7  ;;  %v2337_v10 = vld [vmem:[%s2468_s10 + $0x8] sm:$0xff]   ;;  %v2339_v12 = vld [vmem:[%s2468_s10 + $0x10] sm:$0xff]   ;;  %s2804_s22 = scalar_lea.vmem %s2896_s6, %s2455_s28 }
  0x12   : > { %2158 = vmatmul.mubr.msk.bf16.vlgmr.msra.gmra.mrb[0].mxu1 %vm432_vm3, %v2335_v8  ;;  %2210 = vmatpush3.bf16.msra.mxu0 %v2332_v0  ;;  %v2340_v13 = vld [vmem:[%s2462_s7 + $0x18] sm:$0xff]   ;;  %v2342_v15 = vld [vmem:[%s2462_s7 + $0x20] sm:$0xff]   ;;  %v2344_v17 = vld [vmem:[%s2462_s7 + $0x28] sm:$0xff]  }
  0x13   : > { %2266 = vmatpush3.bf16.msra.mxu1 %v2332_v0  ;;  %2105 = vmatprep.mubr.msk.bf16.mxu0 %vm2396_vm2, %v2394_v1  ;;  %v2341_v14 = vld [vmem:[%s2468_s10 + $0x18] sm:$0xff]   ;;  %v2343_v16 = vld [vmem:[%s2468_s10 + $0x20] sm:$0xff]   ;;  %v2345_v18 = vld [vmem:[%s2468_s10 + $0x28] sm:$0xff]  }
  0x14   : > { %2161 = vmatprep.mubr.msk.bf16.mxu1 %vm2396_vm2, %v2394_v1  ;;  %2211 = vmatprep.subr.bf16.mxu0 %v2394_v1  ;;  %v2346_v19 = vld [vmem:[%s2462_s7 + $0x30] sm:$0xff]   ;;  %v2348_v21 = vld [vmem:[%s2462_s7 + $0x38] sm:$0xff]   ;;  %v2350_v23 = vld [vmem:[%s2462_s7 + $0x40] sm:$0xff]  }
  0x15   : > { %2267 = vmatprep.subr.bf16.mxu1 %v2394_v1  ;;  %v2347_v20 = vld [vmem:[%s2468_s10 + $0x30] sm:$0xff]   ;;  %v2349_v22 = vld [vmem:[%s2468_s10 + $0x38] sm:$0xff]   ;;  %v2351_v24 = vld [vmem:[%s2468_s10 + $0x40] sm:$0xff]  }
  0x16   : > { %2212 = vmatpush3.bf16.msra.mxu0 %v477_v6  ;;  %v2352_v25 = vld [vmem:[%s2462_s7 + $0x48] sm:$0xff]   ;;  %v2354_v27 = vld [vmem:[%s2462_s7 + $0x50] sm:$0xff]   ;;  %v2356_v29 = vld [vmem:[%s2462_s7 + $0x58] sm:$0xff]  }
  0x17   : > { %2268 = vmatpush3.bf16.msra.mxu1 %v477_v6  ;;  %v2353_v26 = vld [vmem:[%s2468_s10 + $0x48] sm:$0xff]   ;;  %v2355_v28 = vld [vmem:[%s2468_s10 + $0x50] sm:$0xff]   ;;  %v2357_v30 = vld [vmem:[%s2468_s10 + $0x58] sm:$0xff]  }
  0x18   : > { %v2358_v31 = vld [vmem:[%s2462_s7 + $0x60] ss:$0 sps:$4 sm:$0xff]   ;;  %v2362_v35 = vld [vmem:[%s2502_s13 + $0x8] sm:$0xff]   ;;  %v2364_v37 = vld [vmem:[%s2502_s13 + $0x10] sm:$0xff]  }
  0x19   : > { %2106 = vmatmul.mubr.msk.bf16.gmra.mrb[4].mxu0 %vm432_vm3, %v2336_v9  ;;  %v2359_v32 = vld [vmem:[%s2468_s10 + $0x60] ss:$0 sps:$4 sm:$0xff]   ;;  %v2363_v36 = vld [vmem:[%s2508_s16 + $0x8] sm:$0xff]   ;;  %v2365_v38 = vld [vmem:[%s2508_s16 + $0x10] sm:$0xff]  }
  0x1a   : > { %2162 = vmatmul.mubr.msk.bf16.gmra.mrb[4].mxu1 %vm432_vm3, %v2337_v10  ;;  %2109 = vmatprep.mubr.msk.bf16.mxu0 %vm2396_vm2, %v2394_v1  ;;  %v2360_v33 = vld [vmem:[%s2502_s13] sm:$0xff]   ;;  %v2366_v39 = vld [vmem:[%s2502_s13 + $0x18] sm:$0xff]   ;;  %v2370_v43 = vld [vmem:[%s2502_s13 + $0x28] sm:$0xff]  }
  0x1b   : > { %2165 = vmatprep.mubr.msk.bf16.mxu1 %vm2396_vm2, %v2394_v1  ;;  %v2361_v34 = vld [vmem:[%s2508_s16] sm:$0xff]   ;;  %v2367_v40 = vld [vmem:[%s2508_s16 + $0x18] sm:$0xff]   ;;  %v2371_v44 = vld [vmem:[%s2508_s16 + $0x28] sm:$0xff]  }
  0x1c   : > { %v2368_v41 = vld [vmem:[%s2502_s13 + $0x20] sm:$0xff]   ;;  %v2372_v45 = vld [vmem:[%s2502_s13 + $0x30] sm:$0xff]   ;;  %v2374_v47 = vld [vmem:[%s2502_s13 + $0x38] sm:$0xff]  }
  0x1d   : > { %v2369_v42 = vld [vmem:[%s2508_s16 + $0x20] sm:$0xff]   ;;  %v2373_v46 = vld [vmem:[%s2508_s16 + $0x30] sm:$0xff]   ;;  %v2375_v48 = vld [vmem:[%s2508_s16 + $0x38] sm:$0xff]  }
  0x1e   : > { %v2376_v49 = vld [vmem:[%s2502_s13 + $0x40] sm:$0xff]   ;;  %v2378_v51 = vld [vmem:[%s2502_s13 + $0x48] sm:$0xff]   ;;  %v2380_v53 = vld [vmem:[%s2502_s13 + $0x50] sm:$0xff]  }
  0x1f   : > { %v2377_v50 = vld [vmem:[%s2508_s16 + $0x40] sm:$0xff]   ;;  %v2379_v52 = vld [vmem:[%s2508_s16 + $0x48] sm:$0xff]   ;;  %v2381_v54 = vld [vmem:[%s2508_s16 + $0x50] sm:$0xff]  }
  0x20   : > { %v2382_v55 = vld [vmem:[%s2502_s13 + $0x58] sm:$0xff]   ;;  %v2384_v57 = vld [vmem:[%s2502_s13 + $0x60] ss:$0 sps:$4 sm:$0xff]  }
  0x21   : > { %2110 = vmatmul.mubr.msk.bf16.gmra.mrb[8].mxu0 %vm432_vm3, %v2338_v11  ;;  %v2383_v56 = vld [vmem:[%s2508_s16 + $0x58] sm:$0xff]   ;;  %v2385_v58 = vld [vmem:[%s2508_s16 + $0x60] ss:$0 sps:$4 sm:$0xff]  }
  0x22   : > { %2166 = vmatmul.mubr.msk.bf16.gmra.mrb[8].mxu1 %vm432_vm3, %v2339_v12  ;;  %2113 = vmatprep.mubr.msk.bf16.mxu0 %vm2396_vm2, %v2394_v1 }
  0x23   : > { %2169 = vmatprep.mubr.msk.bf16.mxu1 %vm2396_vm2, %v2394_v1 }
  0x29   : > { %2114 = vmatmul.mubr.msk.bf16.gmra.mrb[12].mxu0 %vm432_vm3, %v2340_v13 }
  0x2a   : > { %2170 = vmatmul.mubr.msk.bf16.gmra.mrb[12].mxu1 %vm432_vm3, %v2341_v14  ;;  %2117 = vmatprep.mubr.msk.bf16.mxu0 %vm2396_vm2, %v2394_v1 }
  0x2b   : > { %2173 = vmatprep.mubr.msk.bf16.mxu1 %vm2396_vm2, %v2394_v1 }
  0x31   : > { %2118 = vmatmul.mubr.msk.bf16.gmra.mrb[16].mxu0 %vm432_vm3, %v2342_v15 }
  0x32   : > { %2174 = vmatmul.mubr.msk.bf16.gmra.mrb[16].mxu1 %vm432_vm3, %v2343_v16  ;;  %2121 = vmatprep.mubr.msk.bf16.mxu0 %vm2396_vm2, %v2394_v1 }
  0x33   : > { %2177 = vmatprep.mubr.msk.bf16.mxu1 %vm2396_vm2, %v2394_v1 }
  0x39   : > { %2122 = vmatmul.mubr.msk.bf16.gmra.mrb[20].mxu0 %vm432_vm3, %v2344_v17 }
  0x3a   : > { %2178 = vmatmul.mubr.msk.bf16.gmra.mrb[20].mxu1 %vm432_vm3, %v2345_v18  ;;  %2125 = vmatprep.mubr.msk.bf16.mxu0 %vm2396_vm2, %v2394_v1 }
  0x3b   : > { %2181 = vmatprep.mubr.msk.bf16.mxu1 %vm2396_vm2, %v2394_v1 }
  0x41   : > { %2126 = vmatmul.mubr.msk.bf16.gmra.mrb[24].mxu0 %vm432_vm3, %v2346_v19 }
  0x42   : > { %2182 = vmatmul.mubr.msk.bf16.gmra.mrb[24].mxu1 %vm432_vm3, %v2347_v20  ;;  %2129 = vmatprep.mubr.msk.bf16.mxu0 %vm2396_vm2, %v2394_v1 }
  0x43   : > { %2185 = vmatprep.mubr.msk.bf16.mxu1 %vm2396_vm2, %v2394_v1 }
  0x49   : > { %2130 = vmatmul.mubr.msk.bf16.gmra.mrb[28].mxu0 %vm432_vm3, %v2348_v21 }
  0x4a   : > { %2186 = vmatmul.mubr.msk.bf16.gmra.mrb[28].mxu1 %vm432_vm3, %v2349_v22  ;;  %2133 = vmatprep.mubr.msk.bf16.mxu0 %vm2396_vm2, %v2394_v1 }
  0x4b   : > { %2189 = vmatprep.mubr.msk.bf16.mxu1 %vm2396_vm2, %v2394_v1 }
  0x51   : > { %2134 = vmatmul.mubr.msk.bf16.gmra.mrb[32].mxu0 %vm432_vm3, %v2350_v23 }
  0x52   : > { %2190 = vmatmul.mubr.msk.bf16.gmra.mrb[32].mxu1 %vm432_vm3, %v2351_v24  ;;  %2137 = vmatprep.mubr.msk.bf16.mxu0 %vm2396_vm2, %v2394_v1 }
  0x53   : > { %2193 = vmatprep.mubr.msk.bf16.mxu1 %vm2396_vm2, %v2394_v1 }
  0x59   : > { %2138 = vmatmul.mubr.msk.bf16.gmra.mrb[36].mxu0 %vm432_vm3, %v2352_v25 }
  0x5a   : > { %2194 = vmatmul.mubr.msk.bf16.gmra.mrb[36].mxu1 %vm432_vm3, %v2353_v26  ;;  %2141 = vmatprep.mubr.msk.bf16.mxu0 %vm2396_vm2, %v2394_v1 }
  0x5b   : > { %2197 = vmatprep.mubr.msk.bf16.mxu1 %vm2396_vm2, %v2394_v1 }
  0x61   : > { %2142 = vmatmul.mubr.msk.bf16.gmra.mrb[40].mxu0 %vm432_vm3, %v2354_v27 }
  0x62   : > { %2198 = vmatmul.mubr.msk.bf16.gmra.mrb[40].mxu1 %vm432_vm3, %v2355_v28  ;;  %2145 = vmatprep.mubr.msk.bf16.mxu0 %vm2396_vm2, %v2394_v1 }
  0x63   : > { %2201 = vmatprep.mubr.msk.bf16.mxu1 %vm2396_vm2, %v2394_v1 }
  0x69   : > { %2146 = vmatmul.mubr.msk.bf16.gmra.mrb[44].mxu0 %vm432_vm3, %v2356_v29 }
  0x6a   : > { %2202 = vmatmul.mubr.msk.bf16.gmra.mrb[44].mxu1 %vm432_vm3, %v2357_v30  ;;  %2149 = vmatprep.mubr.msk.bf16.mxu0 %vm2396_vm2, %v2394_v1 }
  0x6b   : > { %2205 = vmatprep.mubr.msk.bf16.mxu1 %vm2396_vm2, %v2394_v1 }
  0x71   : > { %2150 = vmatmul.mubr.msk.bf16.gmra.mrb[48].mxu0 %vm432_vm3, %v2358_v31 }
  0x72   : > { %2206 = vmatmul.mubr.msk.bf16.gmra.mrb[48].mxu1 %vm432_vm3, %v2359_v32  ;;  %2213 = vmatprep.mubr.msk.bf16.mxu0 %vm2396_vm2, %v2394_v1 }
  0x73   : > { %2269 = vmatprep.mubr.msk.bf16.mxu1 %vm2396_vm2, %v2394_v1 }
  0x79   : > { %2214 = vmatmul.mubr.msk.bf16.vlgmr.msra.gmra.mrb[52].mxu0 %vm432_vm3, %v2360_v33 }
  0x7a   : > { %2270 = vmatmul.mubr.msk.bf16.vlgmr.msra.gmra.mrb[52].mxu1 %vm432_vm3, %v2361_v34  ;;  %2217 = vmatprep.mubr.msk.bf16.mxu0 %vm2396_vm2, %v2394_v1 }
  0x7b   : > { %2273 = vmatprep.mubr.msk.bf16.mxu1 %vm2396_vm2, %v2394_v1 }
  0x81   : > { %2218 = vmatmul.mubr.msk.bf16.gmra.mrb[56].mxu0 %vm432_vm3, %v2362_v35 }
  0x82   : > { %2274 = vmatmul.mubr.msk.bf16.gmra.mrb[56].mxu1 %vm432_vm3, %v2363_v36  ;;  %2221 = vmatprep.mubr.msk.bf16.mxu0 %vm2396_vm2, %v2394_v1 }
  0x83   : > { %2277 = vmatprep.mubr.msk.bf16.mxu1 %vm2396_vm2, %v2394_v1 }
  0x89   : > { %2222 = vmatmul.mubr.msk.bf16.gmra.mrb[60].mxu0 %vm432_vm3, %v2364_v37 }
  0x8a   : > { %2278 = vmatmul.mubr.msk.bf16.gmra.mrb[60].mxu1 %vm432_vm3, %v2365_v38  ;;  %2225 = vmatprep.mubr.msk.bf16.mxu0 %vm2396_vm2, %v2394_v1 }
  0x8b   : > { %2281 = vmatprep.mubr.msk.bf16.mxu1 %vm2396_vm2, %v2394_v1 }
  0x91   : > { %2226 = vmatmul.mubr.msk.bf16.gmra.mrb[64].mxu0 %vm432_vm3, %v2366_v39 }
  0x92   : > { %2282 = vmatmul.mubr.msk.bf16.gmra.mrb[64].mxu1 %vm432_vm3, %v2367_v40  ;;  %2229 = vmatprep.mubr.msk.bf16.mxu0 %vm2396_vm2, %v2394_v1 }
  0x93   : > { %2285 = vmatprep.mubr.msk.bf16.mxu1 %vm2396_vm2, %v2394_v1 }
  0x99   : > { %2230 = vmatmul.mubr.msk.bf16.gmra.mrb[68].mxu0 %vm432_vm3, %v2368_v41 }
  0x9a   : > { %2286 = vmatmul.mubr.msk.bf16.gmra.mrb[68].mxu1 %vm432_vm3, %v2369_v42  ;;  %2233 = vmatprep.mubr.msk.bf16.mxu0 %vm2396_vm2, %v2394_v1 }
  0x9b   : > { %2289 = vmatprep.mubr.msk.bf16.mxu1 %vm2396_vm2, %v2394_v1 }
  0xa1   : > { %2234 = vmatmul.mubr.msk.bf16.gmra.mrb[72].mxu0 %vm432_vm3, %v2370_v43 }
  0xa2   : > { %2290 = vmatmul.mubr.msk.bf16.gmra.mrb[72].mxu1 %vm432_vm3, %v2371_v44  ;;  %2237 = vmatprep.mubr.msk.bf16.mxu0 %vm2396_vm2, %v2394_v1 }
  0xa3   : > { %2293 = vmatprep.mubr.msk.bf16.mxu1 %vm2396_vm2, %v2394_v1 }
  0xa9   : > { %2238 = vmatmul.mubr.msk.bf16.gmra.mrb[76].mxu0 %vm432_vm3, %v2372_v45 }
  0xaa   : > { %2294 = vmatmul.mubr.msk.bf16.gmra.mrb[76].mxu1 %vm432_vm3, %v2373_v46  ;;  %2241 = vmatprep.mubr.msk.bf16.mxu0 %vm2396_vm2, %v2394_v1 }
  0xab   : > { %2297 = vmatprep.mubr.msk.bf16.mxu1 %vm2396_vm2, %v2394_v1 }
  0xb1   : > { %2242 = vmatmul.mubr.msk.bf16.gmra.mrb[80].mxu0 %vm432_vm3, %v2374_v47 }
  0xb2   : > { %2298 = vmatmul.mubr.msk.bf16.gmra.mrb[80].mxu1 %vm432_vm3, %v2375_v48  ;;  %2245 = vmatprep.mubr.msk.bf16.mxu0 %vm2396_vm2, %v2394_v1 }
  0xb3   : > { %2301 = vmatprep.mubr.msk.bf16.mxu1 %vm2396_vm2, %v2394_v1 }
  0xb9   : > { %2246 = vmatmul.mubr.msk.bf16.gmra.mrb[84].mxu0 %vm432_vm3, %v2376_v49 }
  0xba   : > { %2302 = vmatmul.mubr.msk.bf16.gmra.mrb[84].mxu1 %vm432_vm3, %v2377_v50  ;;  %2249 = vmatprep.mubr.msk.bf16.mxu0 %vm2396_vm2, %v2394_v1 }
  0xbb   : > { %2305 = vmatprep.mubr.msk.bf16.mxu1 %vm2396_vm2, %v2394_v1 }
  0xc1   : > { %2250 = vmatmul.mubr.msk.bf16.gmra.mrb[88].mxu0 %vm432_vm3, %v2378_v51 }
  0xc2   : > { %2306 = vmatmul.mubr.msk.bf16.gmra.mrb[88].mxu1 %vm432_vm3, %v2379_v52  ;;  %2253 = vmatprep.mubr.msk.bf16.mxu0 %vm2396_vm2, %v2394_v1 }
  0xc3   : > { %2309 = vmatprep.mubr.msk.bf16.mxu1 %vm2396_vm2, %v2394_v1 }
  0xc9   : > { %2254 = vmatmul.mubr.msk.bf16.gmra.mrb[92].mxu0 %vm432_vm3, %v2380_v53 }
  0xca   : > { %2310 = vmatmul.mubr.msk.bf16.gmra.mrb[92].mxu1 %vm432_vm3, %v2381_v54  ;;  %2257 = vmatprep.mubr.msk.bf16.mxu0 %vm2396_vm2, %v2394_v1 }
  0xcb   : > { %2313 = vmatprep.mubr.msk.bf16.mxu1 %vm2396_vm2, %v2394_v1 }
  0xd1   : > { %2258 = vmatmul.mubr.msk.bf16.gmra.mrb[96].mxu0 %vm432_vm3, %v2382_v55 }
  0xd2   : > { %2314 = vmatmul.mubr.msk.bf16.gmra.mrb[96].mxu1 %vm432_vm3, %v2383_v56  ;;  %2261 = vmatprep.mubr.msk.bf16.mxu0 %vm2396_vm2, %v2394_v1 }
  0xd3   : > { %2317 = vmatprep.mubr.msk.bf16.mxu1 %vm2396_vm2, %v2394_v1 }
  0xd9   : > { %2262 = vmatmul.mubr.msk.bf16.gmra.mrb[100].mxu0 %vm432_vm3, %v2384_v57 }
  0xda   : > { %2318 = vmatmul.mubr.msk.bf16.gmra.mrb[100].mxu1 %vm432_vm3, %v2385_v58 }
  0xe4   : > { %v513_v60 = vpop.f32.mrb[0].mxu0 }
  0xe5   : > { %v514_v61 = vadd.f32 %v2691_v59, %v513_v60  ;;  %v801_v62 = vpop.f32.mrb[0].mxu1  ;;  %v2103_v63 = vpop.f32.mrb[1].mxu0 }
  0xe6   : > { %v802_v0 = vadd.f32 %v2691_v59, %v801_v62  ;;  %v2159_v2 = vpop.f32.mrb[1].mxu1  ;;  %v516_v1 = vpop.f32.mrb[2].mxu0 }
  0xe7   : > { %v615_v3 = vmax.f32 %v514_v61, 0.0  ;;  %v517_v4 = vadd.f32 %v2691_v59, %v516_v1  ;;  %v804_v5 = vpop.f32.mrb[2].mxu1  ;;  %v2104_v6 = vpop.f32.mrb[3].mxu0 }
  0xe8   : > { %v903_v7 = vmax.f32 %v802_v0, 0.0  ;;  %v805_v8 = vadd.f32 %v2691_v59, %v804_v5  ;;  %v2160_v9 = vpop.f32.mrb[3].mxu1 }
  0xe9   : > { %v616_v10 = vmax.f32 %v517_v4, 0.0 }
  0xea   : > { %v2697_v11 = vmax.f32 %v615_v3, %v903_v7  ;;  %v904_v12 = vmax.f32 %v805_v8, 0.0 }
  0xec   : > { %v2699_v13 = vmax.f32 %v616_v10, %v904_v12  ;;  %v521_v14 = vpop.f32.mrb[4].mxu0 }
  0xed   : > { %v522_v15 = vadd.f32 %v2691_v59, %v521_v14  ;;  %v809_v16 = vpop.f32.mrb[4].mxu1  ;;  %v2107_v17 = vpop.f32.mrb[5].mxu0 }
  0xee   : > { %v810_v18 = vadd.f32 %v2691_v59, %v809_v16  ;;  %v2163_v19 = vpop.f32.mrb[5].mxu1  ;;  %v524_v20 = vpop.f32.mrb[6].mxu0 }
  0xef   : > { %v617_v21 = vmax.f32 %v522_v15, 0.0  ;;  %v525_v22 = vadd.f32 %v2691_v59, %v524_v20  ;;  %v812_v23 = vpop.f32.mrb[6].mxu1  ;;  %v2108_v24 = vpop.f32.mrb[7].mxu0 }
  0xf0   : > { %v905_v25 = vmax.f32 %v810_v18, 0.0  ;;  %v813_v26 = vadd.f32 %v2691_v59, %v812_v23  ;;  %v2164_v27 = vpop.f32.mrb[7].mxu1 }
  0xf1   : > { %v618_v28 = vmax.f32 %v525_v22, 0.0 }
  0xf2   : > { %v2705_v29 = vmax.f32 %v617_v21, %v905_v25  ;;  %v906_v30 = vmax.f32 %v813_v26, 0.0 }
  0xf4   : > { %v2707_v31 = vmax.f32 %v618_v28, %v906_v30  ;;  %v529_v32 = vpop.f32.mrb[8].mxu0 }
  0xf5   : > { %v530_v33 = vadd.f32 %v2691_v59, %v529_v32  ;;  %v817_v34 = vpop.f32.mrb[8].mxu1  ;;  %v2111_v35 = vpop.f32.mrb[9].mxu0 }
  0xf6   : > { %v818_v36 = vadd.f32 %v2691_v59, %v817_v34  ;;  %v2167_v37 = vpop.f32.mrb[9].mxu1  ;;  %v532_v38 = vpop.f32.mrb[10].mxu0 }
  0xf7   : > { %v619_v39 = vmax.f32 %v530_v33, 0.0  ;;  %v533_v40 = vadd.f32 %v2691_v59, %v532_v38  ;;  %v820_v41 = vpop.f32.mrb[10].mxu1  ;;  %v2112_v42 = vpop.f32.mrb[11].mxu0 }
  0xf8   : > { %v907_v43 = vmax.f32 %v818_v36, 0.0  ;;  %v821_v44 = vadd.f32 %v2691_v59, %v820_v41  ;;  %v2168_v45 = vpop.f32.mrb[11].mxu1 }
  0xf9   : > { %v620_v46 = vmax.f32 %v533_v40, 0.0 }
  0xfa   : > { %v2713_v47 = vmax.f32 %v619_v39, %v907_v43  ;;  %v908_v48 = vmax.f32 %v821_v44, 0.0 }
  0xfc   : > { %v2715_v49 = vmax.f32 %v620_v46, %v908_v48  ;;  %v537_v50 = vpop.f32.mrb[12].mxu0 }
  0xfd   : > { %v538_v51 = vadd.f32 %v2691_v59, %v537_v50  ;;  %v825_v52 = vpop.f32.mrb[12].mxu1  ;;  %v2115_v53 = vpop.f32.mrb[13].mxu0 }
  0xfe   : > { %v826_v54 = vadd.f32 %v2691_v59, %v825_v52  ;;  %v2171_v55 = vpop.f32.mrb[13].mxu1  ;;  %v540_v56 = vpop.f32.mrb[14].mxu0 }
  0xff   : > { %v621_v57 = vmax.f32 %v538_v51, 0.0  ;;  %v541_v58 = vadd.f32 %v2691_v59, %v540_v56  ;;  %v828_v60 = vpop.f32.mrb[14].mxu1  ;;  %v2116_v61 = vpop.f32.mrb[15].mxu0 }
 0x100   : > { %v909_v62 = vmax.f32 %v826_v54, 0.0  ;;  %v829_v63 = vadd.f32 %v2691_v59, %v828_v60  ;;  %v2172_v0 = vpop.f32.mrb[15].mxu1 }
 0x101   : > { %v622_v2 = vmax.f32 %v541_v58, 0.0 }
 0x102   : > { %v2721_v1 = vmax.f32 %v621_v57, %v909_v62  ;;  %v910_v3 = vmax.f32 %v829_v63, 0.0 }
 0x104   : > { %v2723_v4 = vmax.f32 %v622_v2, %v910_v3  ;;  %v545_v5 = vpop.f32.mrb[16].mxu0 }
 0x105   : > { %v546_v6 = vadd.f32 %v2691_v59, %v545_v5  ;;  %v833_v7 = vpop.f32.mrb[16].mxu1  ;;  %v2119_v8 = vpop.f32.mrb[17].mxu0 }
 0x106   : > { %v834_v9 = vadd.f32 %v2691_v59, %v833_v7  ;;  %v2175_v10 = vpop.f32.mrb[17].mxu1  ;;  %v548_v12 = vpop.f32.mrb[18].mxu0 }
 0x107   : > { %v623_v14 = vmax.f32 %v546_v6, 0.0  ;;  %v549_v15 = vadd.f32 %v2691_v59, %v548_v12  ;;  %v836_v16 = vpop.f32.mrb[18].mxu1  ;;  %v2120_v17 = vpop.f32.mrb[19].mxu0 }
 0x108   : > { %v911_v18 = vmax.f32 %v834_v9, 0.0  ;;  %v837_v19 = vadd.f32 %v2691_v59, %v836_v16  ;;  %v2176_v20 = vpop.f32.mrb[19].mxu1 }
 0x109   : > { %v624_v21 = vmax.f32 %v549_v15, 0.0 }
 0x10a   : > { %v2729_v22 = vmax.f32 %v623_v14, %v911_v18  ;;  %v912_v23 = vmax.f32 %v837_v19, 0.0 }
 0x10c   : > { %v2731_v24 = vmax.f32 %v624_v21, %v912_v23  ;;  %v553_v25 = vpop.f32.mrb[20].mxu0 }
 0x10d   : > { %v554_v26 = vadd.f32 %v2691_v59, %v553_v25  ;;  %v841_v27 = vpop.f32.mrb[20].mxu1  ;;  %v2123_v28 = vpop.f32.mrb[21].mxu0 }
 0x10e   : > { %v842_v30 = vadd.f32 %v2691_v59, %v841_v27  ;;  %v2179_v32 = vpop.f32.mrb[21].mxu1  ;;  %v556_v33 = vpop.f32.mrb[22].mxu0 }
 0x10f   : > { %v625_v34 = vmax.f32 %v554_v26, 0.0  ;;  %v557_v35 = vadd.f32 %v2691_v59, %v556_v33  ;;  %v844_v36 = vpop.f32.mrb[22].mxu1  ;;  %v2124_v37 = vpop.f32.mrb[23].mxu0 }
 0x110   : > { %v913_v38 = vmax.f32 %v842_v30, 0.0  ;;  %v845_v39 = vadd.f32 %v2691_v59, %v844_v36  ;;  %v2180_v40 = vpop.f32.mrb[23].mxu1 }
 0x111   : > { %v626_v41 = vmax.f32 %v557_v35, 0.0 }
 0x112   : > { %v2737_v42 = vmax.f32 %v625_v34, %v913_v38  ;;  %v914_v43 = vmax.f32 %v845_v39, 0.0 }
 0x114   : > { %v2739_v44 = vmax.f32 %v626_v41, %v914_v43  ;;  %v561_v45 = vpop.f32.mrb[24].mxu0 }
 0x115   : > { %v562_v46 = vadd.f32 %v2691_v59, %v561_v45  ;;  %v849_v48 = vpop.f32.mrb[24].mxu1  ;;  %v2127_v50 = vpop.f32.mrb[25].mxu0 }
 0x116   : > { %v850_v51 = vadd.f32 %v2691_v59, %v849_v48  ;;  %v2183_v52 = vpop.f32.mrb[25].mxu1  ;;  %v564_v53 = vpop.f32.mrb[26].mxu0 }
 0x117   : > { %v627_v54 = vmax.f32 %v562_v46, 0.0  ;;  %v565_v55 = vadd.f32 %v2691_v59, %v564_v53  ;;  %v852_v56 = vpop.f32.mrb[26].mxu1  ;;  %v2128_v57 = vpop.f32.mrb[27].mxu0 }
 0x118   : > { %v915_v58 = vmax.f32 %v850_v51, 0.0  ;;  %v853_v60 = vadd.f32 %v2691_v59, %v852_v56  ;;  %v2184_v61 = vpop.f32.mrb[27].mxu1 }
 0x119   : > { %v628_v62 = vmax.f32 %v565_v55, 0.0 }
 0x11a   : > { %v2745_v63 = vmax.f32 %v627_v54, %v915_v58  ;;  %v916_v0 = vmax.f32 %v853_v60, 0.0 }
 0x11c   : > { %v2747_v2 = vmax.f32 %v628_v62, %v916_v0  ;;  %v569_v3 = vpop.f32.mrb[28].mxu0 }
 0x11d   : > { %v570_v5 = vadd.f32 %v2691_v59, %v569_v3  ;;  %v857_v6 = vpop.f32.mrb[28].mxu1  ;;  %v2131_v7 = vpop.f32.mrb[29].mxu0 }
 0x11e   : > { %v858_v8 = vadd.f32 %v2691_v59, %v857_v6  ;;  %v2187_v9 = vpop.f32.mrb[29].mxu1  ;;  %v572_v10 = vpop.f32.mrb[30].mxu0 }
 0x11f   : > { %v629_v12 = vmax.f32 %v570_v5, 0.0  ;;  %v573_v14 = vadd.f32 %v2691_v59, %v572_v10  ;;  %v860_v15 = vpop.f32.mrb[30].mxu1  ;;  %v2132_v16 = vpop.f32.mrb[31].mxu0 }
 0x120   : > { %v917_v17 = vmax.f32 %v858_v8, 0.0  ;;  %v861_v18 = vadd.f32 %v2691_v59, %v860_v15  ;;  %v2188_v19 = vpop.f32.mrb[31].mxu1 }
 0x121   : > { %v630_v20 = vmax.f32 %v573_v14, 0.0 }
 0x122   : > { %v2753_v21 = vmax.f32 %v629_v12, %v917_v17  ;;  %v918_v23 = vmax.f32 %v861_v18, 0.0 }
 0x124   : > { %v2755_v25 = vmax.f32 %v630_v20, %v918_v23  ;;  %v577_v26 = vpop.f32.mrb[32].mxu0 }
 0x125   : > { %v578_v27 = vadd.f32 %v2691_v59, %v577_v26  ;;  %v865_v28 = vpop.f32.mrb[32].mxu1  ;;  %v2135_v30 = vpop.f32.mrb[33].mxu0 }
 0x126   : > { %v866_v32 = vadd.f32 %v2691_v59, %v865_v28  ;;  %v2191_v33 = vpop.f32.mrb[33].mxu1  ;;  %v580_v34 = vpop.f32.mrb[34].mxu0 }
 0x127   : > { %v631_v35 = vmax.f32 %v578_v27, 0.0  ;;  %v581_v36 = vadd.f32 %v2691_v59, %v580_v34  ;;  %v868_v37 = vpop.f32.mrb[34].mxu1  ;;  %v2136_v38 = vpop.f32.mrb[35].mxu0 }
 0x128   : > { %v919_v39 = vmax.f32 %v866_v32, 0.0  ;;  %v869_v40 = vadd.f32 %v2691_v59, %v868_v37  ;;  %v2192_v41 = vpop.f32.mrb[35].mxu1 }
 0x129   : > { %v632_v43 = vmax.f32 %v581_v36, 0.0 }
 0x12a   : > { %v2761_v45 = vmax.f32 %v631_v35, %v919_v39  ;;  %v920_v46 = vmax.f32 %v869_v40, 0.0 }
 0x12c   : > { %v2763_v48 = vmax.f32 %v632_v43, %v920_v46  ;;  %v585_v50 = vpop.f32.mrb[36].mxu0 }
 0x12d   : > { %v586_v51 = vadd.f32 %v2691_v59, %v585_v50  ;;  %v873_v52 = vpop.f32.mrb[36].mxu1  ;;  %v2139_v53 = vpop.f32.mrb[37].mxu0 }
 0x12e   : > { %v874_v54 = vadd.f32 %v2691_v59, %v873_v52  ;;  %v2195_v55 = vpop.f32.mrb[37].mxu1  ;;  %v588_v56 = vpop.f32.mrb[38].mxu0 }
 0x12f   : > { %v633_v57 = vmax.f32 %v586_v51, 0.0  ;;  %v589_v58 = vadd.f32 %v2691_v59, %v588_v56  ;;  %v876_v60 = vpop.f32.mrb[38].mxu1  ;;  %v2140_v61 = vpop.f32.mrb[39].mxu0 }
 0x130   : > { %v921_v62 = vmax.f32 %v874_v54, 0.0  ;;  %v877_v0 = vadd.f32 %v2691_v59, %v876_v60  ;;  %v2196_v3 = vpop.f32.mrb[39].mxu1 }
 0x131   : > { %v634_v5 = vmax.f32 %v589_v58, 0.0 }
 0x132   : > { %v2769_v6 = vmax.f32 %v633_v57, %v921_v62  ;;  %v922_v7 = vmax.f32 %v877_v0, 0.0 }
 0x134   : > { %v2771_v8 = vmax.f32 %v634_v5, %v922_v7  ;;  %v593_v9 = vpop.f32.mrb[40].mxu0 }
 0x135   : > { %v594_v10 = vadd.f32 %v2691_v59, %v593_v9  ;;  %v881_v12 = vpop.f32.mrb[40].mxu1  ;;  %v2143_v14 = vpop.f32.mrb[41].mxu0 }
 0x136   : > { %v882_v15 = vadd.f32 %v2691_v59, %v881_v12  ;;  %v2199_v16 = vpop.f32.mrb[41].mxu1  ;;  %v596_v17 = vpop.f32.mrb[42].mxu0 }
 0x137   : > { %v635_v18 = vmax.f32 %v594_v10, 0.0  ;;  %v597_v19 = vadd.f32 %v2691_v59, %v596_v17  ;;  %v884_v20 = vpop.f32.mrb[42].mxu1  ;;  %v2144_v23 = vpop.f32.mrb[43].mxu0 }
 0x138   : > { %v923_v26 = vmax.f32 %v882_v15, 0.0  ;;  %v885_v27 = vadd.f32 %v2691_v59, %v884_v20  ;;  %v2200_v28 = vpop.f32.mrb[43].mxu1 }
 0x139   : > { %v636_v30 = vmax.f32 %v597_v19, 0.0 }
 0x13a   : > { %v2777_v32 = vmax.f32 %v635_v18, %v923_v26  ;;  %v924_v33 = vmax.f32 %v885_v27, 0.0 }
 0x13c   : > { %v2779_v34 = vmax.f32 %v636_v30, %v924_v33  ;;  %v601_v35 = vpop.f32.mrb[44].mxu0 }
 0x13d   : > { %v602_v36 = vadd.f32 %v2691_v59, %v601_v35  ;;  %v889_v37 = vpop.f32.mrb[44].mxu1  ;;  %v2147_v38 = vpop.f32.mrb[45].mxu0 }
 0x13e   : > { %v890_v39 = vadd.f32 %v2691_v59, %v889_v37  ;;  %v2203_v40 = vpop.f32.mrb[45].mxu1  ;;  %v604_v41 = vpop.f32.mrb[46].mxu0 }
 0x13f   : > { %v637_v43 = vmax.f32 %v602_v36, 0.0  ;;  %v605_v46 = vadd.f32 %v2691_v59, %v604_v41  ;;  %v892_v50 = vpop.f32.mrb[46].mxu1  ;;  %v2148_v51 = vpop.f32.mrb[47].mxu0 }
 0x140   : > { %v925_v52 = vmax.f32 %v890_v39, 0.0  ;;  %v893_v53 = vadd.f32 %v2691_v59, %v892_v50  ;;  %v2204_v54 = vpop.f32.mrb[47].mxu1 }
 0x141   : > { %v638_v55 = vmax.f32 %v605_v46, 0.0 }
 0x142   : > { %v2785_v56 = vmax.f32 %v637_v43, %v925_v52  ;;  %v926_v57 = vmax.f32 %v893_v53, 0.0 }
 0x144   : > { %v2787_v58 = vmax.f32 %v638_v55, %v926_v57  ;;  %v609_v60 = vpop.f32.mrb[48].mxu0 }
 0x145   : > { %v610_v61 = vadd.f32 %v2691_v59, %v609_v60  ;;  %v897_v62 = vpop.f32.mrb[48].mxu1  ;;  %v2151_v0 = vpop.f32.mrb[49].mxu0 }
 0x146   : > { %v898_v3 = vadd.f32 %v2691_v59, %v897_v62  ;;  %v2207_v5 = vpop.f32.mrb[49].mxu1  ;;  %v612_v7 = vpop.f32.mrb[50].mxu0 }
 0x147   : > { %v639_v9 = vmax.f32 %v610_v61, 0.0  ;;  %v900_v10 = vpop.f32.mrb[50].mxu1  ;;  %v2152_v12 = vpop.f32.mrb[51].mxu0 }
 0x148   : > { %v927_v14 = vmax.f32 %v898_v3, 0.0  ;;  %v2208_v15 = vpop.f32.mrb[51].mxu1 }
 0x14a   : > { %v2791_v16 = vmax.f32 %v639_v9, %v927_v14 }
 0x14c   : > { %v1114_v17 = vpop.f32.mrb[52].mxu0 }
 0x14d   : > { %v1115_v18 = vadd.f32 %v2691_v59, %v1114_v17  ;;  %v1427_v19 = vpop.f32.mrb[52].mxu1  ;;  %v2215_v20 = vpop.f32.mrb[53].mxu0 }
 0x14e   : > { %v1428_v23 = vadd.f32 %v2691_v59, %v1427_v19  ;;  %v2271_v26 = vpop.f32.mrb[53].mxu1  ;;  %v1117_v27 = vpop.f32.mrb[54].mxu0 }
 0x14f   : > { %v1216_v28 = vmax.f32 %v1115_v18, 0.0  ;;  %v1118_v30 = vadd.f32 %v2691_v59, %v1117_v27  ;;  %v1430_v33 = vpop.f32.mrb[54].mxu1  ;;  %v2216_v35 = vpop.f32.mrb[55].mxu0 }
 0x150   : > { %v1529_v36 = vmax.f32 %v1428_v23, 0.0  ;;  %v1431_v37 = vadd.f32 %v2691_v59, %v1430_v33  ;;  %v2272_v38 = vpop.f32.mrb[55].mxu1 }
 0x151   : > { %v1241_v39 = vmax.f32 %v2697_v11, %v1216_v28  ;;  %v1217_v40 = vmax.f32 %v1118_v30, 0.0 }
 0x152   : > { %v1530_v46 = vmax.f32 %v1431_v37, 0.0 }
 0x153   : > { %v1554_v41 = vmax.f32 %v1241_v39, %v1529_v36  ;;  %v1242_v43 = vmax.f32 %v2699_v13, %v1217_v40 }
 0x154   : > { %v1122_v50 = vpop.f32.mrb[56].mxu0 }
 0x155   : > { %v1555_v51 = vmax.f32 %v1242_v43, %v1530_v46  ;;  %v1123_v52 = vadd.f32 %v2691_v59, %v1122_v50  ;;  %v1435_v53 = vpop.f32.mrb[56].mxu1  ;;  %v2219_v54 = vpop.f32.mrb[57].mxu0 }
 0x156   : > { %v1436_v55 = vadd.f32 %v2691_v59, %v1435_v53  ;;  %v2275_v11 = vpop.f32.mrb[57].mxu1  ;;  %v1125_v57 = vpop.f32.mrb[58].mxu0 }
 0x157   : > { %v1969_v60 = vpack.c.bf16 %v1555_v51, %v1554_v41  ;;  %v1218_v61 = vmax.f32 %v1123_v52, 0.0  ;;  %v1126_v13 = vadd.f32 %v2691_v59, %v1125_v57  ;;  %v1438_v62 = vpop.f32.mrb[58].mxu1  ;;  %v2220_v0 = vpop.f32.mrb[59].mxu0 }
 0x158   : > { %v1531_v3 = vmax.f32 %v1436_v55, 0.0  ;;  %v1439_v5 = vadd.f32 %v2691_v59, %v1438_v62  ;;  %v2276_v7 = vpop.f32.mrb[59].mxu1 }
 0x159   : > { %1970 = vst [vmem:[%s2804_s22] sm:$0xff] %v1969_v60   ;;  %v1243_v9 = vmax.f32 %v2705_v29, %v1218_v61  ;;  %v1219_v10 = vmax.f32 %v1126_v13, 0.0 }
 0x15a   : > { %v1532_v15 = vmax.f32 %v1439_v5, 0.0 }
 0x15b   : > { %v1556_v12 = vmax.f32 %v1243_v9, %v1531_v3  ;;  %v1244_v14 = vmax.f32 %v2707_v31, %v1219_v10 }
 0x15c   : > { %v1130_v17 = vpop.f32.mrb[60].mxu0 }
 0x15d   : > { %v1557_v18 = vmax.f32 %v1244_v14, %v1532_v15  ;;  %v1131_v19 = vadd.f32 %v2691_v59, %v1130_v17  ;;  %v1443_v20 = vpop.f32.mrb[60].mxu1  ;;  %v2223_v23 = vpop.f32.mrb[61].mxu0 }
 0x15e   : > { %v1444_v26 = vadd.f32 %v2691_v59, %v1443_v20  ;;  %v2279_v27 = vpop.f32.mrb[61].mxu1  ;;  %v1133_v28 = vpop.f32.mrb[62].mxu0 }
 0x15f   : > { %v1974_v30 = vpack.c.bf16 %v1557_v18, %v1556_v12  ;;  %v1220_v33 = vmax.f32 %v1131_v19, 0.0  ;;  %v1134_v29 = vadd.f32 %v2691_v59, %v1133_v28  ;;  %v1446_v35 = vpop.f32.mrb[62].mxu1  ;;  %v2224_v36 = vpop.f32.mrb[63].mxu0 }
 0x160   : > { %v1533_v37 = vmax.f32 %v1444_v26, 0.0  ;;  %v1447_v31 = vadd.f32 %v2691_v59, %v1446_v35  ;;  %v2280_v38 = vpop.f32.mrb[63].mxu1 }
 0x161   : > { %2026 = vst [vmem:[%s2804_s22 + $0x8] sm:$0xff] %v1974_v30   ;;  %v1245_v39 = vmax.f32 %v2713_v47, %v1220_v33  ;;  %v1221_v40 = vmax.f32 %v1134_v29, 0.0 }
 0x162   : > { %v1534_v46 = vmax.f32 %v1447_v31, 0.0 }
 0x163   : > { %v1558_v41 = vmax.f32 %v1245_v39, %v1533_v37  ;;  %v1246_v43 = vmax.f32 %v2715_v49, %v1221_v40 }
 0x164   : > { %v1138_v50 = vpop.f32.mrb[64].mxu0 }
 0x165   : > { %v1559_v51 = vmax.f32 %v1246_v43, %v1534_v46  ;;  %v1139_v52 = vadd.f32 %v2691_v59, %v1138_v50  ;;  %v1451_v53 = vpop.f32.mrb[64].mxu1  ;;  %v2227_v54 = vpop.f32.mrb[65].mxu0 }
 0x166   : > { %v1452_v55 = vadd.f32 %v2691_v59, %v1451_v53  ;;  %v2283_v11 = vpop.f32.mrb[65].mxu1  ;;  %v1141_v57 = vpop.f32.mrb[66].mxu0 }
 0x167   : > { %v1979_v60 = vpack.c.bf16 %v1559_v51, %v1558_v41  ;;  %v1222_v61 = vmax.f32 %v1139_v52, 0.0  ;;  %v1142_v47 = vadd.f32 %v2691_v59, %v1141_v57  ;;  %v1454_v13 = vpop.f32.mrb[66].mxu1  ;;  %v2228_v62 = vpop.f32.mrb[67].mxu0 }
 0x168   : > { %v1535_v0 = vmax.f32 %v1452_v55, 0.0  ;;  %v1455_v49 = vadd.f32 %v2691_v59, %v1454_v13  ;;  %v2284_v3 = vpop.f32.mrb[67].mxu1 }
 0x169   : > { %2027 = vst [vmem:[%s2804_s22 + $0x10] sm:$0xff] %v1979_v60   ;;  %v1247_v5 = vmax.f32 %v2721_v1, %v1222_v61  ;;  %v1223_v7 = vmax.f32 %v1142_v47, 0.0 }
 0x16a   : > { %v1536_v12 = vmax.f32 %v1455_v49, 0.0 }
 0x16b   : > { %v1560_v9 = vmax.f32 %v1247_v5, %v1535_v0  ;;  %v1248_v10 = vmax.f32 %v2723_v4, %v1223_v7 }
 0x16c   : > { %v1146_v14 = vpop.f32.mrb[68].mxu0 }
 0x16d   : > { %v1561_v15 = vmax.f32 %v1248_v10, %v1536_v12  ;;  %v1147_v17 = vadd.f32 %v2691_v59, %v1146_v14  ;;  %v1459_v18 = vpop.f32.mrb[68].mxu1  ;;  %v2231_v19 = vpop.f32.mrb[69].mxu0 }
 0x16e   : > { %v1460_v20 = vadd.f32 %v2691_v59, %v1459_v18  ;;  %v2287_v23 = vpop.f32.mrb[69].mxu1  ;;  %v1149_v26 = vpop.f32.mrb[70].mxu0 }
 0x16f   : > { %v1984_v27 = vpack.c.bf16 %v1561_v15, %v1560_v9  ;;  %v1224_v28 = vmax.f32 %v1147_v17, 0.0  ;;  %v1150_v1 = vadd.f32 %v2691_v59, %v1149_v26  ;;  %v1462_v30 = vpop.f32.mrb[70].mxu1  ;;  %v2232_v33 = vpop.f32.mrb[71].mxu0 }
 0x170   : > { %v1537_v29 = vmax.f32 %v1460_v20, 0.0  ;;  %v1463_v4 = vadd.f32 %v2691_v59, %v1462_v30  ;;  %v2288_v35 = vpop.f32.mrb[71].mxu1 }
 0x171   : > { %2028 = vst [vmem:[%s2804_s22 + $0x18] sm:$0xff] %v1984_v27   ;;  %v1249_v36 = vmax.f32 %v2729_v22, %v1224_v28  ;;  %v1225_v37 = vmax.f32 %v1150_v1, 0.0 }
 0x172   : > { %v1538_v39 = vmax.f32 %v1463_v4, 0.0 }
 0x173   : > { %v1562_v31 = vmax.f32 %v1249_v36, %v1537_v29  ;;  %v1250_v38 = vmax.f32 %v2731_v24, %v1225_v37 }
 0x174   : > { %v1154_v40 = vpop.f32.mrb[72].mxu0 }
 0x175   : > { %v1563_v41 = vmax.f32 %v1250_v38, %v1538_v39  ;;  %v1155_v43 = vadd.f32 %v2691_v59, %v1154_v40  ;;  %v1467_v46 = vpop.f32.mrb[72].mxu1  ;;  %v2235_v50 = vpop.f32.mrb[73].mxu0 }
 0x176   : > { %v1468_v51 = vadd.f32 %v2691_v59, %v1467_v46  ;;  %v2291_v52 = vpop.f32.mrb[73].mxu1  ;;  %v1157_v53 = vpop.f32.mrb[74].mxu0 }
 0x177   : > { %v1989_v54 = vpack.c.bf16 %v1563_v41, %v1562_v31  ;;  %v1226_v55 = vmax.f32 %v1155_v43, 0.0  ;;  %v1158_v22 = vadd.f32 %v2691_v59, %v1157_v53  ;;  %v1470_v11 = vpop.f32.mrb[74].mxu1  ;;  %v2236_v57 = vpop.f32.mrb[75].mxu0 }
 0x178   : > { %v1539_v60 = vmax.f32 %v1468_v51, 0.0  ;;  %v1471_v24 = vadd.f32 %v2691_v59, %v1470_v11  ;;  %v2292_v61 = vpop.f32.mrb[75].mxu1 }
 0x179   : > { %2029 = vst [vmem:[%s2804_s22 + $0x20] sm:$0xff] %v1989_v54   ;;  %v1251_v47 = vmax.f32 %v2737_v42, %v1226_v55  ;;  %v1227_v13 = vmax.f32 %v1158_v22, 0.0 }
 0x17a   : > { %v1540_v49 = vmax.f32 %v1471_v24, 0.0 }
 0x17b   : > { %v1564_v62 = vmax.f32 %v1251_v47, %v1539_v60  ;;  %v1252_v0 = vmax.f32 %v2739_v44, %v1227_v13 }
 0x17c   : > { %v1162_v3 = vpop.f32.mrb[76].mxu0 }
 0x17d   : > { %v1565_v5 = vmax.f32 %v1252_v0, %v1540_v49  ;;  %v1163_v7 = vadd.f32 %v2691_v59, %v1162_v3  ;;  %v1475_v9 = vpop.f32.mrb[76].mxu1  ;;  %v2239_v10 = vpop.f32.mrb[77].mxu0 }
 0x17e   : > { %v1476_v12 = vadd.f32 %v2691_v59, %v1475_v9  ;;  %v2295_v14 = vpop.f32.mrb[77].mxu1  ;;  %v1165_v15 = vpop.f32.mrb[78].mxu0 }
 0x17f   : > { %v1994_v17 = vpack.c.bf16 %v1565_v5, %v1564_v62  ;;  %v1228_v18 = vmax.f32 %v1163_v7, 0.0  ;;  %v1166_v42 = vadd.f32 %v2691_v59, %v1165_v15  ;;  %v1478_v19 = vpop.f32.mrb[78].mxu1  ;;  %v2240_v20 = vpop.f32.mrb[79].mxu0 }
 0x180   : > { %v1541_v23 = vmax.f32 %v1476_v12, 0.0  ;;  %v1479_v44 = vadd.f32 %v2691_v59, %v1478_v19  ;;  %v2296_v26 = vpop.f32.mrb[79].mxu1 }
 0x181   : > { %2030 = vst [vmem:[%s2804_s22 + $0x28] sm:$0xff] %v1994_v17   ;;  %v1253_v27 = vmax.f32 %v2745_v63, %v1228_v18  ;;  %v1229_v28 = vmax.f32 %v1166_v42, 0.0 }
 0x182   : > { %v1542_v33 = vmax.f32 %v1479_v44, 0.0 }
 0x183   : > { %v1566_v1 = vmax.f32 %v1253_v27, %v1541_v23  ;;  %v1254_v30 = vmax.f32 %v2747_v2, %v1229_v28 }
 0x184   : > { %v1170_v29 = vpop.f32.mrb[80].mxu0 }
 0x185   : > { %v1567_v4 = vmax.f32 %v1254_v30, %v1542_v33  ;;  %v1171_v35 = vadd.f32 %v2691_v59, %v1170_v29  ;;  %v1483_v36 = vpop.f32.mrb[80].mxu1  ;;  %v2243_v37 = vpop.f32.mrb[81].mxu0 }
 0x186   : > { %v1484_v31 = vadd.f32 %v2691_v59, %v1483_v36  ;;  %v2299_v38 = vpop.f32.mrb[81].mxu1  ;;  %v1173_v39 = vpop.f32.mrb[82].mxu0 }
 0x187   : > { %v1999_v40 = vpack.c.bf16 %v1567_v4, %v1566_v1  ;;  %v1230_v41 = vmax.f32 %v1171_v35, 0.0  ;;  %v1174_v63 = vadd.f32 %v2691_v59, %v1173_v39  ;;  %v1486_v43 = vpop.f32.mrb[82].mxu1  ;;  %v2244_v46 = vpop.f32.mrb[83].mxu0 }
 0x188   : > { %v1543_v50 = vmax.f32 %v1484_v31, 0.0  ;;  %v1487_v2 = vadd.f32 %v2691_v59, %v1486_v43  ;;  %v2300_v51 = vpop.f32.mrb[83].mxu1 }
 0x189   : > { %2031 = vst [vmem:[%s2804_s22 + $0x30] sm:$0xff] %v1999_v40   ;;  %v1255_v52 = vmax.f32 %v2753_v21, %v1230_v41  ;;  %v1231_v53 = vmax.f32 %v1174_v63, 0.0 }
 0x18a   : > { %v1544_v22 = vmax.f32 %v1487_v2, 0.0 }
 0x18b   : > { %v1568_v54 = vmax.f32 %v1255_v52, %v1543_v50  ;;  %v1256_v55 = vmax.f32 %v2755_v25, %v1231_v53 }
 0x18c   : > { %v1178_v11 = vpop.f32.mrb[84].mxu0 }
 0x18d   : > { %v1569_v57 = vmax.f32 %v1256_v55, %v1544_v22  ;;  %v1179_v60 = vadd.f32 %v2691_v59, %v1178_v11  ;;  %v1491_v24 = vpop.f32.mrb[84].mxu1  ;;  %v2247_v61 = vpop.f32.mrb[85].mxu0 }
 0x18e   : > { %v1492_v47 = vadd.f32 %v2691_v59, %v1491_v24  ;;  %v2303_v13 = vpop.f32.mrb[85].mxu1  ;;  %v1181_v62 = vpop.f32.mrb[86].mxu0 }
 0x18f   : > { %v2004_v0 = vpack.c.bf16 %v1569_v57, %v1568_v54  ;;  %v1232_v49 = vmax.f32 %v1179_v60, 0.0  ;;  %v1182_v21 = vadd.f32 %v2691_v59, %v1181_v62  ;;  %v1494_v3 = vpop.f32.mrb[86].mxu1  ;;  %v2248_v5 = vpop.f32.mrb[87].mxu0 }
 0x190   : > { %v1545_v7 = vmax.f32 %v1492_v47, 0.0  ;;  %v1495_v25 = vadd.f32 %v2691_v59, %v1494_v3  ;;  %v2304_v9 = vpop.f32.mrb[87].mxu1 }
 0x191   : > { %2032 = vst [vmem:[%s2804_s22 + $0x38] sm:$0xff] %v2004_v0   ;;  %v1257_v10 = vmax.f32 %v2761_v45, %v1232_v49  ;;  %v1233_v12 = vmax.f32 %v1182_v21, 0.0 }
 0x192   : > { %v1546_v17 = vmax.f32 %v1495_v25, 0.0 }
 0x193   : > { %v1570_v14 = vmax.f32 %v1257_v10, %v1545_v7  ;;  %v1258_v15 = vmax.f32 %v2763_v48, %v1233_v12 }
 0x194   : > { %v1186_v18 = vpop.f32.mrb[88].mxu0 }
 0x195   : > { %v1571_v42 = vmax.f32 %v1258_v15, %v1546_v17  ;;  %v1187_v19 = vadd.f32 %v2691_v59, %v1186_v18  ;;  %v1499_v20 = vpop.f32.mrb[88].mxu1  ;;  %v2251_v23 = vpop.f32.mrb[89].mxu0 }
 0x196   : > { %v1500_v44 = vadd.f32 %v2691_v59, %v1499_v20  ;;  %v2307_v26 = vpop.f32.mrb[89].mxu1  ;;  %v1189_v27 = vpop.f32.mrb[90].mxu0 }
 0x197   : > { %v2009_v28 = vpack.c.bf16 %v1571_v42, %v1570_v14  ;;  %v1234_v1 = vmax.f32 %v1187_v19, 0.0  ;;  %v1190_v45 = vadd.f32 %v2691_v59, %v1189_v27  ;;  %v1502_v30 = vpop.f32.mrb[90].mxu1  ;;  %v2252_v33 = vpop.f32.mrb[91].mxu0 }
 0x198   : > { %v1547_v29 = vmax.f32 %v1500_v44, 0.0  ;;  %v1503_v48 = vadd.f32 %v2691_v59, %v1502_v30  ;;  %v2308_v4 = vpop.f32.mrb[91].mxu1 }
 0x199   : > { %2033 = vst [vmem:[%s2804_s22 + $0x40] sm:$0xff] %v2009_v28   ;;  %v1259_v35 = vmax.f32 %v2769_v6, %v1234_v1  ;;  %v1235_v36 = vmax.f32 %v1190_v45, 0.0 }
 0x19a   : > { %v1548_v38 = vmax.f32 %v1503_v48, 0.0 }
 0x19b   : > { %v1572_v37 = vmax.f32 %v1259_v35, %v1547_v29  ;;  %v1260_v31 = vmax.f32 %v2771_v8, %v1235_v36 }
 0x19c   : > { %v1194_v39 = vpop.f32.mrb[92].mxu0 }
 0x19d   : > { %v1573_v40 = vmax.f32 %v1260_v31, %v1548_v38  ;;  %v1195_v41 = vadd.f32 %v2691_v59, %v1194_v39  ;;  %v1507_v63 = vpop.f32.mrb[92].mxu1  ;;  %v2255_v43 = vpop.f32.mrb[93].mxu0 }
 0x19e   : > { %v1508_v46 = vadd.f32 %v2691_v59, %v1507_v63  ;;  %v2311_v50 = vpop.f32.mrb[93].mxu1  ;;  %v1197_v2 = vpop.f32.mrb[94].mxu0 }
 0x19f   : > { %v2014_v51 = vpack.c.bf16 %v1573_v40, %v1572_v37  ;;  %v1236_v52 = vmax.f32 %v1195_v41, 0.0  ;;  %v1198_v6 = vadd.f32 %v2691_v59, %v1197_v2  ;;  %v1510_v53 = vpop.f32.mrb[94].mxu1  ;;  %v2256_v54 = vpop.f32.mrb[95].mxu0 }
 0x1a0   : > { %v1549_v55 = vmax.f32 %v1508_v46, 0.0  ;;  %v1511_v8 = vadd.f32 %v2691_v59, %v1510_v53  ;;  %v2312_v22 = vpop.f32.mrb[95].mxu1 }
 0x1a1   : > { %2034 = vst [vmem:[%s2804_s22 + $0x48] sm:$0xff] %v2014_v51   ;;  %v1261_v11 = vmax.f32 %v2777_v32, %v1236_v52  ;;  %v1237_v57 = vmax.f32 %v1198_v6, 0.0 }
 0x1a2   : > { %v1550_v61 = vmax.f32 %v1511_v8, 0.0 }
 0x1a3   : > { %v1574_v60 = vmax.f32 %v1261_v11, %v1549_v55  ;;  %v1262_v24 = vmax.f32 %v2779_v34, %v1237_v57 }
 0x1a4   : > { %v1202_v47 = vpop.f32.mrb[96].mxu0 }
 0x1a5   : > { %v1575_v13 = vmax.f32 %v1262_v24, %v1550_v61  ;;  %v1203_v62 = vadd.f32 %v2691_v59, %v1202_v47  ;;  %v1515_v0 = vpop.f32.mrb[96].mxu1  ;;  %v2259_v49 = vpop.f32.mrb[97].mxu0 }
 0x1a6   : > { %v1516_v21 = vadd.f32 %v2691_v59, %v1515_v0  ;;  %v2315_v3 = vpop.f32.mrb[97].mxu1  ;;  %v1205_v5 = vpop.f32.mrb[98].mxu0 }
 0x1a7   : > { %v2019_v7 = vpack.c.bf16 %v1575_v13, %v1574_v60  ;;  %v1238_v25 = vmax.f32 %v1203_v62, 0.0  ;;  %v1206_v32 = vadd.f32 %v2691_v59, %v1205_v5  ;;  %v1518_v9 = vpop.f32.mrb[98].mxu1  ;;  %v2260_v10 = vpop.f32.mrb[99].mxu0 }
 0x1a8   : > { %v1551_v12 = vmax.f32 %v1516_v21, 0.0  ;;  %v1519_v34 = vadd.f32 %v2691_v59, %v1518_v9  ;;  %v2316_v14 = vpop.f32.mrb[99].mxu1 }
 0x1a9   : > { %2035 = vst [vmem:[%s2804_s22 + $0x50] sm:$0xff] %v2019_v7   ;;  %v1263_v15 = vmax.f32 %v2785_v56, %v1238_v25  ;;  %v1239_v17 = vmax.f32 %v1206_v32, 0.0 }
 0x1aa   : > { %v1552_v19 = vmax.f32 %v1519_v34, 0.0 }
 0x1ab   : > { %v1576_v18 = vmax.f32 %v1263_v15, %v1551_v12  ;;  %v1264_v42 = vmax.f32 %v2787_v58, %v1239_v17 }
 0x1ac   : > { %v1210_v20 = vpop.f32.mrb[100].mxu0 }
 0x1ad   : > { %v1577_v23 = vmax.f32 %v1264_v42, %v1552_v19  ;;  %v1211_v44 = vadd.f32 %v2691_v59, %v1210_v20  ;;  %v1523_v26 = vpop.f32.mrb[100].mxu1  ;;  %v2263_v27 = vpop.f32.mrb[101].mxu0 }
 0x1ae   : > { %v1524_v28 = vadd.f32 %v2691_v59, %v1523_v26  ;;  %v2319_v1 = vpop.f32.mrb[101].mxu1  ;;  %v1213_v45 = vpop.f32.mrb[102].mxu0 }
 0x1af   : > { %v2024_v30 = vpack.c.bf16 %v1577_v23, %v1576_v18  ;;  %v1240_v33 = vmax.f32 %v1211_v44, 0.0  ;;  %v1526_v56 = vpop.f32.mrb[102].mxu1  ;;  %v2264_v29 = vpop.f32.mrb[103].mxu0 }
 0x1b0   : > { %v1553_v48 = vmax.f32 %v1524_v28, 0.0  ;;  %v2320_v4 = vpop.f32.mrb[103].mxu1 }
 0x1b1   : > { %2036 = vst [vmem:[%s2804_s22 + $0x58] sm:$0xff] %v2024_v30   ;;  %v1265_v58 = vmax.f32 %v2791_v16, %v1240_v33 }
 0x1b3   : > { %v1578_v35 = vmax.f32 %v1265_v58, %v1553_v48 }
 0x1b5   : > { %v1965_v36 = vpack.c.bf16 %v1578_v35, %v1578_v35 }
 0x1b7   : > { %1704 = vst [vmem:[%s2804_s22 + $0x60] sm:$0xf] %v1965_v36 }
 0x1b8 PF: > { %s16_s21 = sadd.s32 1, %s2392_s21  }
 0x1b9   : > { %p13_p4 = scmp.ge.s32.totalorder %s16_s21, 4  }
 0x1bb   :  { %15 = sbr.rel (!%p13_p4) target bundleno = 1 (0x1), region = 83 }

// kernel: _lambda_.4
= control target key start
LH: loop header
LB: loop body
LE: loop exit
PB: predicated region body
PF: predicated region fallthrough
CT: control target
= control target key end

     0   :  { %s2098_s21 = smov 0   ;;  %s2577_s0 = inlined_call_operand.vmem [shape: bf16[112,400], index: 0, kind: input, shape index: {}]   ;;  %s2578_s1 = inlined_call_operand.vmem [shape: bf16[112,400], index: 1, kind: input, shape index: {}]   ;;  %s2579_s2 = inlined_call_operand.vmem [shape: bf16[112,400], index: 2, kind: input, shape index: {}]   ;;  %s2580_s3 = inlined_call_operand.vmem [shape: bf16[112,400], index: 3, kind: input, shape index: {}]   ;;  %s2581_s4 = inlined_call_operand.vmem [shape: bf16[400,128], index: 4, kind: input, shape index: {}]   ;;  %s2582_s5 = inlined_call_operand.vmem [shape: f32[1,128], index: 5, kind: input, shape index: {}]   ;;  %s2583_s6 = inlined_call_operand.vmem [shape: bf16[112,128], index: 6, kind: output, shape index: {}]  }
   0x1 LB: > { %s1615_s22 = sadd.s32 4294967295, %s2060_s21   ;;  %p1619_p0 = scmp.ge.s32.totalorder %s2060_s21, 1  ;;  %s2060_s21 = sphi %s2098_s21, %s16_s21  }
   0x2   : > { %p250_p1 = scmp.lt.s32.totalorder %s2060_s21, 3 }
   0x4   : > { %p251_p2 = pnand %p1619_p0, %p250_p1 }
   0x5   : > { %v2109_v0 = vld [vmem:[%s2581_s4 + $0x40] sm:$0xff] (!%p251_p2)   ;;  %v2062_v1 = vmov (!%p251_p2), 0   ;;  %v2127_v4 = vld [vmem:[%s2581_s4 + $0x48] sm:$0xff] (!%p251_p2)   ;;  %v2145_v7 = vld [vmem:[%s2581_s4 + $0x50] sm:$0xff] (!%p251_p2)   ;;  %s299_s15 = smul.u32 (!%p251_p2), 7, %s1615_s22  ;;  %vm625_vm0 = vcmask (!%p251_p2), 130048  }
   0x6   : > { %254 = sbr.rel (%p251_p2) target bundleno = 395 (0x18b), region = 44  ;;  %702 = vmatprep.subr.bf16.mxu1 (!%p251_p2), %v2062_v1  ;;  %v2115_v2 = vld [vmem:[%s2581_s4 + $0x80] sm:$0xff] (!%p251_p2)   ;;  %1772 = vmatprep.subr.bf16.mxu0 (!%p251_p2), %v2109_v0  ;;  %v2134_v5 = vld [vmem:[%s2581_s4 + $0x88] sm:$0xff] (!%p251_p2)   ;;  %v2151_v8 = vld [vmem:[%s2581_s4 + $0x90] sm:$0xff] (!%p251_p2)  }
   0x7   : > { %v2121_v3 = vld [vmem:[%s2581_s4] sm:$0xff] (!%p251_p2)   ;;  %703 = vmatpush1.bf16.msra.mxu1 (!%p251_p2), %v2115_v2  ;;  %v2140_v6 = vld [vmem:[%s2581_s4 + $0x8] sm:$0xff] (!%p251_p2)   ;;  %v2158_v9 = vld [vmem:[%s2581_s4 + $0x10] sm:$0xff] (!%p251_p2)   ;;  %p300_p3 = scmp.lt.s32.totalorder (!%p251_p2), %s299_s15, 13 }
   0x8   : > { %1773 = vmatpush3.bf16.msra.mxu0 (!%p251_p2), %v2121_v3  ;;  %704 = vmatprep.subr.bf16.mxu1 (!%p251_p2), %v2062_v1  ;;  %v2164_v10 = vld [vmem:[%s2581_s4 + $0x58] sm:$0xff] (!%p251_p2)   ;;  %v2183_v13 = vld [vmem:[%s2581_s4 + $0x60] sm:$0xff] (!%p251_p2)   ;;  %v2204_v16 = vld [vmem:[%s2581_s4 + $0x68] sm:$0xff] (!%p251_p2)  }
   0x9   : > { %1774 = vmatprep.subr.bf16.mxu0 (!%p251_p2), %v2127_v4  ;;  %v2170_v11 = vld [vmem:[%s2581_s4 + $0x98] sm:$0xff] (!%p251_p2)   ;;  %v2189_v14 = vld [vmem:[%s2581_s4 + $0xa0] sm:$0xff] (!%p251_p2)   ;;  %v2210_v17 = vld [vmem:[%s2581_s4 + $0xa8] sm:$0xff] (!%p251_p2)  }
   0xa   : > { %v2177_v12 = vld [vmem:[%s2581_s4 + $0x18] sm:$0xff] (!%p251_p2)   ;;  %v2198_v15 = vld [vmem:[%s2581_s4 + $0x20] sm:$0xff] (!%p251_p2)   ;;  %v2220_v18 = vld [vmem:[%s2581_s4 + $0x28] sm:$0xff] (!%p251_p2)  }
   0xb   : > { %705 = vmatpush1.bf16.msra.mxu1 (!%p251_p2), %v2134_v5  ;;  %v2226_v19 = vld [vmem:[%s2581_s4 + $0x70] sm:$0xff] (!%p251_p2)   ;;  %v2250_v22 = vld [vmem:[%s2581_s4 + $0x78] sm:$0xff] (!%p251_p2)   ;;  %v2275_v28 = vld [vmem:[%s2581_s4 + $0xc0] sm:$0xff] (!%p251_p2)  }
   0xc   : > { %1775 = vmatpush3.bf16.msra.mxu0 (!%p251_p2), %v2140_v6  ;;  %706 = vmatprep.subr.bf16.mxu1 (!%p251_p2), %v2062_v1  ;;  %v2231_v20 = vld [vmem:[%s2581_s4 + $0xb0] sm:$0xff] (!%p251_p2)   ;;  %v2258_v24 = vld [vmem:[%s2581_s4 + $0xb8] sm:$0xff] (!%p251_p2)  }
   0xd   : > { %1776 = vmatprep.subr.bf16.mxu0 %v2145_v7  ;;  %s2585_s15 = smov (!%p300_p3, %s299_s15), 13  ;;  %v2243_v21 = vld [vmem:[%s2581_s4 + $0x30] sm:$0xff]   ;;  %v2266_v26 = vld [vmem:[%s2581_s4 + $0x38] sm:$0xff]  }
   0xe   : > { %s2213_s11 = sshll.u32 %s2585_s15, 4 }
   0xf   : > { %707 = vmatpush1.bf16.msra.mxu1 %v2151_v8  ;;  %s2237_s22 = scalar_lea.vmem %s2577_s0, %s2213_s11  ;;  %s2283_s12 = scalar_lea.vmem %s2578_s1, %s2213_s11 }
  0x10   : > { %1777 = vmatpush3.bf16.msra.mxu0 %v2158_v9  ;;  %708 = vmatprep.subr.bf16.mxu1 %v2062_v1  ;;  %v1967_v23 = vld [vmem:[%s2237_s22 + $0x4] ss:$16 sps:$4 sm:$0xff]   ;;  %v1971_v25 = vld [vmem:[%s2237_s22 + $0xc] ss:$16 sps:$4 sm:$0xff]   ;;  %v1965_v27 = vld [vmem:[%s2237_s22] ss:$16 sps:$4 sm:$0xff]   ;;  %s2304_s16 = scalar_lea.vmem %s2579_s2, %s2213_s11  ;;  %s2325_s19 = scalar_lea.vmem %s2580_s3, %s2213_s11 }
  0x11   : > { %1778 = vmatprep.subr.bf16.mxu0 %v2164_v10  ;;  %670 = vmatprep.mubr.bf16.mxu0 %v1967_v23  ;;  %v1972_v29 = vld [vmem:[%s2237_s22 + $0x24] ss:$16 sps:$4 sm:$0xff]   ;;  %v1969_v30 = vld [vmem:[%s2237_s22 + $0x8] ss:$16 sps:$4 sm:$0xff]   ;;  %v1975_v31 = vld [vmem:[%s2237_s22 + $0x2c] ss:$16 sps:$4 sm:$0xff]  }
  0x12   : > { %1671 = vmatprep.mubr.msk.bf16.mxu1 %vm625_vm0, %v1971_v25  ;;  %v1974_v32 = vld [vmem:[%s2237_s22 + $0x20] ss:$16 sps:$4 sm:$0xff]   ;;  %v1978_v33 = vld [vmem:[%s2237_s22 + $0x44] ss:$16 sps:$4 sm:$0xff]   ;;  %v1977_v34 = vld [vmem:[%s2237_s22 + $0x28] ss:$16 sps:$4 sm:$0xff]  }
  0x13   : > { %709 = vmatpush1.bf16.msra.mxu1 %v2170_v11  ;;  %v1981_v35 = vld [vmem:[%s2237_s22 + $0x4c] ss:$16 sps:$4 sm:$0xff]   ;;  %v397_v36 = vld [vmem:[%s2237_s22 + $0x60] sm:$0xff]  ;;  %v1983_v40 = vld [vmem:[%s2237_s22 + $0x48] ss:$16 sps:$4 sm:$0xff]  }
  0x14   : > { %1779 = vmatpush3.bf16.msra.mxu0 %v2177_v12  ;;  %710 = vmatprep.subr.bf16.mxu1 %v2062_v1  ;;  %v1980_v37 = vld [vmem:[%s2237_s22 + $0x40] ss:$16 sps:$4 sm:$0xff]   ;;  %v398_v38 = vld [vmem:[%s2237_s22 + $0x68] sm:$0xff]  ;;  %v1643_v39 = vcombine.high %v397_v36, %v397_v36  ;;  %v1642_v42 = vcombine.low %v397_v36, %v397_v36  ;;  %v1990_v43 = vld [vmem:[%s2283_s12 + $0x4] ss:$16 sps:$4 sm:$0xff]   ;;  %s1628_s22 = sshll.u32 %s2585_s15, 2 }
  0x15   : > { %1780 = vmatprep.subr.bf16.mxu0 %v2183_v13  ;;  %v1645_v41 = vcombine.high %v398_v38, %v398_v38  ;;  %v1644_v44 = vcombine.low %v398_v38, %v398_v38  ;;  %v1993_v45 = vld [vmem:[%s2283_s12 + $0xc] ss:$16 sps:$4 sm:$0xff]   ;;  %v1988_v46 = vld [vmem:[%s2283_s12] ss:$16 sps:$4 sm:$0xff]   ;;  %v1994_v47 = vld [vmem:[%s2283_s12 + $0x24] ss:$16 sps:$4 sm:$0xff]   ;;  %s2559_s25 = scalar_lea.vmem %s2583_s6, %s1628_s22 }
  0x16   : > { %v1991_v48 = vld [vmem:[%s2283_s12 + $0x8] ss:$16 sps:$4 sm:$0xff]   ;;  %v1996_v49 = vld [vmem:[%s2283_s12 + $0x20] ss:$16 sps:$4 sm:$0xff]   ;;  %v1997_v50 = vld [vmem:[%s2283_s12 + $0x2c] ss:$16 sps:$4 sm:$0xff]  }
  0x17   : > { %711 = vmatpush1.bf16.msra.mxu1 %v2189_v14  ;;  %v2000_v51 = vld [vmem:[%s2283_s12 + $0x44] ss:$16 sps:$4 sm:$0xff]   ;;  %v1999_v52 = vld [vmem:[%s2283_s12 + $0x28] ss:$16 sps:$4 sm:$0xff]   ;;  %v2002_v54 = vld [vmem:[%s2283_s12 + $0x40] ss:$16 sps:$4 sm:$0xff]  }
  0x18   : > { %1781 = vmatpush3.bf16.msra.mxu0 %v2198_v15  ;;  %712 = vmatprep.subr.bf16.mxu1 %v2062_v1  ;;  %v785_v53 = vld [vmem:[%s2283_s12 + $0x60] sm:$0xff]  ;;  %v2003_v55 = vld [vmem:[%s2283_s12 + $0x4c] ss:$16 sps:$4 sm:$0xff]   ;;  %v2005_v58 = vld [vmem:[%s2283_s12 + $0x48] ss:$16 sps:$4 sm:$0xff]  }
  0x19   : > { %1782 = vmatprep.subr.bf16.mxu0 %v2204_v16  ;;  %v1688_v56 = vcombine.high %v785_v53, %v785_v53  ;;  %v786_v57 = vld [vmem:[%s2283_s12 + $0x68] sm:$0xff]  ;;  %v1687_v59 = vcombine.low %v785_v53, %v785_v53  ;;  %v2012_v61 = vld [vmem:[%s2304_s16 + $0x4] ss:$16 sps:$4 sm:$0xff]   ;;  %v2010_v23 = vld [vmem:[%s2304_s16] ss:$16 sps:$4 sm:$0xff]  }
  0x1a   : > { %v1690_v60 = vcombine.high %v786_v57, %v786_v57  ;;  %v1689_v62 = vcombine.low %v786_v57, %v786_v57  ;;  %v2015_v63 = vld [vmem:[%s2304_s16 + $0xc] ss:$16 sps:$4 sm:$0xff]   ;;  %v2016_v25 = vld [vmem:[%s2304_s16 + $0x24] ss:$16 sps:$4 sm:$0xff]   ;;  %v2471_v36 = vld [vmem:[%s2582_s5] ss:$0 sm:$0xff] }
  0x1b   : > { %713 = vmatpush1.bf16.msra.mxu1 %v2210_v17 }
  0x1c   : > { %1783 = vmatpush3.bf16.msra.mxu0 %v2220_v18  ;;  %714 = vmatprep.subr.bf16.mxu1 %v2062_v1 }
  0x1d   : > { %1784 = vmatprep.subr.bf16.mxu0 %v2226_v19 }
  0x1f   : > { %715 = vmatpush1.bf16.msra.mxu1 %v2231_v20 }
  0x20   : > { %1785 = vmatpush3.bf16.msra.mxu0 %v2243_v21  ;;  %716 = vmatprep.subr.bf16.mxu1 %v2062_v1 }
  0x21   : > { %1786 = vmatprep.subr.bf16.mxu0 %v2250_v22 }
  0x23   : > { %717 = vmatpush1.bf16.msra.mxu1 %v2258_v24 }
  0x24   : > { %1787 = vmatpush3.bf16.msra.mxu0 %v2266_v26  ;;  %718 = vmatprep.subr.bf16.mxu1 %v2062_v1 }
  0x25   : > { %1812 = vmatprep.subr.bf16.mxu0 %v2109_v0 }
  0x27   : > { %671 = vmatmul.mubr.bf16.vlgmr.msra.gmra.mrb[0].mxu0 %v1965_v27  ;;  %719 = vmatpush1.bf16.msra.mxu1 %v2275_v28  ;;  %v2018_v27 = vld [vmem:[%s2304_s16 + $0x20] ss:$16 sps:$4 sm:$0xff]  }
  0x28   : > { %1813 = vmatpush3.bf16.msra.mxu0 %v2121_v3  ;;  %933 = vmatprep.subr.bf16.mxu1 %v2062_v1 }
  0x29   : > { %1814 = vmatprep.subr.bf16.mxu0 %v2127_v4  ;;  %678 = vmatprep.mubr.bf16.mxu0 %v1972_v29  ;;  %v2013_v29 = vld [vmem:[%s2304_s16 + $0x8] ss:$16 sps:$4 sm:$0xff]  }
  0x2a   : > { %735 = vmatmul.mubr.bf16.vlgmr.msra.gmra.mrb[0].mxu1 %v1969_v30  ;;  %v2021_v30 = vld [vmem:[%s2304_s16 + $0x28] ss:$16 sps:$4 sm:$0xff]  }
  0x2b   : > { %934 = vmatpush1.bf16.msra.mxu1 %v2115_v2  ;;  %1672 = vmatprep.mubr.msk.bf16.mxu1 %vm625_vm0, %v1975_v31 }
  0x2c   : > { %1815 = vmatpush3.bf16.msra.mxu0 %v2140_v6  ;;  %935 = vmatprep.subr.bf16.mxu1 %v2062_v1 }
  0x2d   : > { %1816 = vmatprep.subr.bf16.mxu0 %v2145_v7 }
  0x2f   : > { %936 = vmatpush1.bf16.msra.mxu1 %v2134_v5  ;;  %679 = vmatmul.mubr.bf16.gmra.mrb[4].mxu0 %v1974_v32  ;;  %v2051_v32 = vld [vmem:[%s2325_s19 + $0x48] ss:$16 sps:$4 sm:$0xff]  }
  0x30   : > { %1817 = vmatpush3.bf16.msra.mxu0 %v2158_v9  ;;  %937 = vmatprep.subr.bf16.mxu1 %v2062_v1 }
  0x31   : > { %1818 = vmatprep.subr.bf16.mxu0 %v2164_v10  ;;  %686 = vmatprep.mubr.bf16.mxu0 %v1978_v33 }
  0x32   : > { %743 = vmatmul.mubr.bf16.gmra.mrb[4].mxu1 %v1977_v34 }
  0x33   : > { %938 = vmatpush1.bf16.msra.mxu1 %v2151_v8  ;;  %1673 = vmatprep.mubr.msk.bf16.mxu1 %vm625_vm0, %v1981_v35 }
  0x34   : > { %1819 = vmatpush3.bf16.msra.mxu0 %v2177_v12  ;;  %939 = vmatprep.subr.bf16.mxu1 %v2062_v1 }
  0x35   : > { %1820 = vmatprep.subr.bf16.mxu0 %v2183_v13 }
  0x37   : > { %940 = vmatpush1.bf16.msra.mxu1 %v2170_v11  ;;  %687 = vmatmul.mubr.bf16.gmra.mrb[8].mxu0 %v1980_v37 }
  0x38   : > { %1821 = vmatpush3.bf16.msra.mxu0 %v2198_v15  ;;  %941 = vmatprep.subr.bf16.mxu1 %v2062_v1 }
  0x39   : > { %1822 = vmatprep.subr.bf16.mxu0 %v2204_v16  ;;  %694 = vmatprep.mubr.bf16.mxu0 %v1643_v39 }
  0x3a   : > { %751 = vmatmul.mubr.bf16.gmra.mrb[8].mxu1 %v1983_v40 }
  0x3b   : > { %942 = vmatpush1.bf16.msra.mxu1 %v2189_v14  ;;  %1674 = vmatprep.mubr.msk.bf16.mxu1 %vm625_vm0, %v1645_v41 }
  0x3c   : > { %1823 = vmatpush3.bf16.msra.mxu0 %v2220_v18  ;;  %943 = vmatprep.subr.bf16.mxu1 %v2062_v1 }
  0x3d   : > { %1824 = vmatprep.subr.bf16.mxu0 %v2226_v19 }
  0x3f   : > { %944 = vmatpush1.bf16.msra.mxu1 %v2210_v17  ;;  %695 = vmatmul.mubr.bf16.gmra.mrb[12].mxu0 %v1642_v42 }
  0x40   : > { %1825 = vmatpush3.bf16.msra.mxu0 %v2243_v21  ;;  %945 = vmatprep.subr.bf16.mxu1 %v2062_v1 }
  0x41   : > { %1826 = vmatprep.subr.bf16.mxu0 %v2250_v22  ;;  %901 = vmatprep.mubr.bf16.mxu0 %v1990_v43 }
  0x42   : > { %759 = vmatmul.mubr.bf16.gmra.mrb[12].mxu1 %v1644_v44 }
  0x43   : > { %946 = vmatpush1.bf16.msra.mxu1 %v2231_v20  ;;  %1691 = vmatprep.mubr.msk.bf16.mxu1 %vm625_vm0, %v1993_v45 }
  0x44   : > { %1827 = vmatpush3.bf16.msra.mxu0 %v2266_v26  ;;  %947 = vmatprep.subr.bf16.mxu1 %v2062_v1 }
  0x45   : > { %1852 = vmatprep.subr.bf16.mxu0 %v2109_v0 }
  0x47   : > { %948 = vmatpush1.bf16.msra.mxu1 %v2258_v24  ;;  %902 = vmatmul.mubr.bf16.vlgmr.msra.gmra.mrb[16].mxu0 %v1988_v46 }
  0x48   : > { %949 = vmatprep.subr.bf16.mxu1 %v2062_v1  ;;  %1853 = vmatpush3.bf16.msra.mxu0 %v2121_v3 }
  0x49   : > { %909 = vmatprep.mubr.bf16.mxu0 %v1994_v47  ;;  %1854 = vmatprep.subr.bf16.mxu0 %v2127_v4 }
  0x4b   : > { %950 = vmatpush1.bf16.msra.mxu1 %v2275_v28 }
  0x4c   : > { %1171 = vmatprep.subr.bf16.mxu1 %v2062_v1  ;;  %1855 = vmatpush3.bf16.msra.mxu0 %v2140_v6 }
  0x4d   : > { %1856 = vmatprep.subr.bf16.mxu0 %v2145_v7 }
  0x4e   : > { %966 = vmatmul.mubr.bf16.vlgmr.msra.gmra.mrb[16].mxu1 %v1991_v48 }
  0x4f   : > { %1172 = vmatpush1.bf16.msra.mxu1 %v2115_v2  ;;  %910 = vmatmul.mubr.bf16.gmra.mrb[20].mxu0 %v1996_v49 }
  0x50   : > { %1173 = vmatprep.subr.bf16.mxu1 %v2062_v1  ;;  %1692 = vmatprep.mubr.msk.bf16.mxu1 %vm625_vm0, %v1997_v50 }
  0x51   : > { %1857 = vmatpush3.bf16.msra.mxu0 %v2158_v9  ;;  %917 = vmatprep.mubr.bf16.mxu0 %v2000_v51 }
  0x52   : > { %1858 = vmatprep.subr.bf16.mxu0 %v2164_v10 }
  0x53   : > { %1174 = vmatpush1.bf16.msra.mxu1 %v2134_v5 }
  0x54   : > { %1175 = vmatprep.subr.bf16.mxu1 %v2062_v1 }
  0x55   : > { %1859 = vmatpush3.bf16.msra.mxu0 %v2177_v12 }
  0x56   : > { %974 = vmatmul.mubr.bf16.gmra.mrb[20].mxu1 %v1999_v52  ;;  %1860 = vmatprep.subr.bf16.mxu0 %v2183_v13 }
  0x57   : > { %1176 = vmatpush1.bf16.msra.mxu1 %v2151_v8  ;;  %918 = vmatmul.mubr.bf16.gmra.mrb[24].mxu0 %v2002_v54 }
  0x58   : > { %1177 = vmatprep.subr.bf16.mxu1 %v2062_v1  ;;  %1693 = vmatprep.mubr.msk.bf16.mxu1 %vm625_vm0, %v2003_v55 }
  0x59   : > { %1861 = vmatpush3.bf16.msra.mxu0 %v2198_v15  ;;  %925 = vmatprep.mubr.bf16.mxu0 %v1688_v56 }
  0x5a   : > { %1862 = vmatprep.subr.bf16.mxu0 %v2204_v16 }
  0x5b   : > { %1178 = vmatpush1.bf16.msra.mxu1 %v2170_v11 }
  0x5c   : > { %1179 = vmatprep.subr.bf16.mxu1 %v2062_v1 }
  0x5d   : > { %1863 = vmatpush3.bf16.msra.mxu0 %v2220_v18 }
  0x5e   : > { %982 = vmatmul.mubr.bf16.gmra.mrb[24].mxu1 %v2005_v58  ;;  %1864 = vmatprep.subr.bf16.mxu0 %v2226_v19 }
  0x5f   : > { %1180 = vmatpush1.bf16.msra.mxu1 %v2189_v14  ;;  %926 = vmatmul.mubr.bf16.gmra.mrb[28].mxu0 %v1687_v59 }
  0x60   : > { %1181 = vmatprep.subr.bf16.mxu1 %v2062_v1  ;;  %1694 = vmatprep.mubr.msk.bf16.mxu1 %vm625_vm0, %v1690_v60 }
  0x61   : > { %1865 = vmatpush3.bf16.msra.mxu0 %v2243_v21  ;;  %1139 = vmatprep.mubr.bf16.mxu0 %v2012_v61 }
  0x62   : > { %1866 = vmatprep.subr.bf16.mxu0 %v2250_v22 }
  0x63   : > { %1182 = vmatpush1.bf16.msra.mxu1 %v2210_v17 }
  0x64   : > { %1183 = vmatprep.subr.bf16.mxu1 %v2062_v1 }
  0x65   : > { %1867 = vmatpush3.bf16.msra.mxu0 %v2266_v26 }
  0x66   : > { %990 = vmatmul.mubr.bf16.gmra.mrb[28].mxu1 %v1689_v62  ;;  %1892 = vmatprep.subr.bf16.mxu0 %v2109_v0  ;;  %v2022_v0 = vld [vmem:[%s2304_s16 + $0x44] ss:$16 sps:$4 sm:$0xff]  }
  0x67   : > { %1184 = vmatpush1.bf16.msra.mxu1 %v2231_v20  ;;  %1711 = vmatprep.mubr.msk.bf16.mxu1 %vm625_vm0, %v2015_v63 }
  0x68   : > { %1185 = vmatprep.subr.bf16.mxu1 %v2062_v1  ;;  %1140 = vmatmul.mubr.bf16.vlgmr.msra.gmra.mrb[32].mxu0 %v2010_v23 }
  0x69   : > { %1893 = vmatpush3.bf16.msra.mxu0 %v2121_v3  ;;  %1147 = vmatprep.mubr.bf16.mxu0 %v2016_v25  ;;  %v2019_v3 = vld [vmem:[%s2304_s16 + $0x2c] ss:$16 sps:$4 sm:$0xff]  }
  0x6a   : > { %1894 = vmatprep.subr.bf16.mxu0 %v2127_v4  ;;  %v1023_v4 = vld [vmem:[%s2304_s16 + $0x60] sm:$0xff] }
  0x6b   : > { %1186 = vmatpush1.bf16.msra.mxu1 %v2258_v24 }
  0x6c   : > { %1187 = vmatprep.subr.bf16.mxu1 %v2062_v1 }
  0x6d   : > { %1895 = vmatpush3.bf16.msra.mxu0 %v2140_v6  ;;  %v2024_v6 = vld [vmem:[%s2304_s16 + $0x40] ss:$16 sps:$4 sm:$0xff]  }
  0x6e   : > { %1896 = vmatprep.subr.bf16.mxu0 %v2145_v7  ;;  %v1708_v7 = vcombine.high %v1023_v4, %v1023_v4 }
  0x6f   : > { %1188 = vmatpush1.bf16.msra.mxu1 %v2275_v28 }
  0x70   : > { %1409 = vmatprep.subr.bf16.mxu1 %v2062_v1  ;;  %1148 = vmatmul.mubr.bf16.gmra.mrb[36].mxu0 %v2018_v27 }
  0x71   : > { %1897 = vmatpush3.bf16.msra.mxu0 %v2158_v9  ;;  %1155 = vmatprep.mubr.bf16.mxu0 %v2022_v0  ;;  %v2025_v9 = vld [vmem:[%s2304_s16 + $0x4c] ss:$16 sps:$4 sm:$0xff]  }
  0x72   : > { %1204 = vmatmul.mubr.bf16.vlgmr.msra.gmra.mrb[32].mxu1 %v2013_v29  ;;  %1898 = vmatprep.subr.bf16.mxu0 %v2164_v10  ;;  %v1024_v10 = vld [vmem:[%s2304_s16 + $0x68] sm:$0xff] }
  0x73   : > { %1410 = vmatpush1.bf16.msra.mxu1 %v2115_v2  ;;  %1712 = vmatprep.mubr.msk.bf16.mxu1 %vm625_vm0, %v2019_v3  ;;  %v1707_v2 = vcombine.low %v1023_v4, %v1023_v4 }
  0x74   : > { %1411 = vmatprep.subr.bf16.mxu1 %v2062_v1 }
  0x75   : > { %1899 = vmatpush3.bf16.msra.mxu0 %v2177_v12  ;;  %v2027_v12 = vld [vmem:[%s2304_s16 + $0x48] ss:$16 sps:$4 sm:$0xff]  }
  0x76   : > { %1900 = vmatprep.subr.bf16.mxu0 %v2183_v13  ;;  %v1710_v13 = vcombine.high %v1024_v10, %v1024_v10 }
  0x77   : > { %1412 = vmatpush1.bf16.msra.mxu1 %v2134_v5  ;;  %v2034_v5 = vld [vmem:[%s2325_s19 + $0x4] ss:$16 sps:$4 sm:$0xff]  }
  0x78   : > { %1413 = vmatprep.subr.bf16.mxu1 %v2062_v1  ;;  %1156 = vmatmul.mubr.bf16.gmra.mrb[40].mxu0 %v2024_v6 }
  0x79   : > { %1901 = vmatpush3.bf16.msra.mxu0 %v2198_v15  ;;  %1163 = vmatprep.mubr.bf16.mxu0 %v1708_v7  ;;  %v1709_v15 = vcombine.low %v1024_v10, %v1024_v10 }
  0x7a   : > { %1212 = vmatmul.mubr.bf16.gmra.mrb[36].mxu1 %v2021_v30  ;;  %1902 = vmatprep.subr.bf16.mxu0 %v2204_v16  ;;  %v2039_v16 = vld [vmem:[%s2325_s19 + $0xc] ss:$16 sps:$4 sm:$0xff]  }
  0x7b   : > { %1414 = vmatpush1.bf16.msra.mxu1 %v2151_v8  ;;  %1713 = vmatprep.mubr.msk.bf16.mxu1 %vm625_vm0, %v2025_v9  ;;  %v2032_v8 = vld [vmem:[%s2325_s19] ss:$16 sps:$4 sm:$0xff]  }
  0x7c   : > { %1415 = vmatprep.subr.bf16.mxu1 %v2062_v1 }
  0x7d   : > { %1903 = vmatpush3.bf16.msra.mxu0 %v2220_v18  ;;  %v2041_v18 = vld [vmem:[%s2325_s19 + $0x44] ss:$16 sps:$4 sm:$0xff]  }
  0x7e   : > { %1904 = vmatprep.subr.bf16.mxu0 %v2226_v19  ;;  %v1261_v19 = vld [vmem:[%s2325_s19 + $0x60] sm:$0xff] }
  0x7f   : > { %1416 = vmatpush1.bf16.msra.mxu1 %v2170_v11  ;;  %v2035_v11 = vld [vmem:[%s2325_s19 + $0x24] ss:$16 sps:$4 sm:$0xff]   ;;  %v1727_v31 = vcombine.low %v1261_v19, %v1261_v19 }
  0x80   : > { %1417 = vmatprep.subr.bf16.mxu1 %v2062_v1  ;;  %1164 = vmatmul.mubr.bf16.gmra.mrb[44].mxu0 %v1707_v2 }
  0x81   : > { %1905 = vmatpush3.bf16.msra.mxu0 %v2243_v21  ;;  %1377 = vmatprep.mubr.bf16.mxu0 %v2034_v5  ;;  %v2045_v21 = vld [vmem:[%s2325_s19 + $0x40] ss:$16 sps:$4 sm:$0xff]  }
  0x82   : > { %1220 = vmatmul.mubr.bf16.gmra.mrb[40].mxu1 %v2027_v12  ;;  %1906 = vmatprep.subr.bf16.mxu0 %v2250_v22  ;;  %v1728_v22 = vcombine.high %v1261_v19, %v1261_v19 }
  0x83   : > { %1418 = vmatpush1.bf16.msra.mxu1 %v2189_v14  ;;  %1714 = vmatprep.mubr.msk.bf16.mxu1 %vm625_vm0, %v1710_v13  ;;  %v2040_v14 = vld [vmem:[%s2325_s19 + $0x20] ss:$16 sps:$4 sm:$0xff]  }
  0x84   : > { %1419 = vmatprep.subr.bf16.mxu1 %v2062_v1 }
  0x85   : > { %1907 = vmatpush3.bf16.msra.mxu0 %v2266_v26  ;;  %v2046_v26 = vld [vmem:[%s2325_s19 + $0x28] ss:$16 sps:$4 sm:$0xff]  }
  0x87   : > { %1420 = vmatpush1.bf16.msra.mxu1 %v2210_v17  ;;  %v2037_v17 = vld [vmem:[%s2325_s19 + $0x8] ss:$16 sps:$4 sm:$0xff]  }
  0x88   : > { %1421 = vmatprep.subr.bf16.mxu1 %v2062_v1  ;;  %1378 = vmatmul.mubr.bf16.vlgmr.msra.gmra.mrb[48].mxu0 %v2032_v8 }
  0x89   : > { %1385 = vmatprep.mubr.bf16.mxu0 %v2035_v11 }
  0x8a   : > { %1228 = vmatmul.mubr.bf16.gmra.mrb[44].mxu1 %v1709_v15 }
  0x8b   : > { %1422 = vmatpush1.bf16.msra.mxu1 %v2231_v20  ;;  %1731 = vmatprep.mubr.msk.bf16.mxu1 %vm625_vm0, %v2039_v16  ;;  %v2043_v20 = vld [vmem:[%s2325_s19 + $0x2c] ss:$16 sps:$4 sm:$0xff]  }
  0x8c   : > { %1423 = vmatprep.subr.bf16.mxu1 %v2062_v1 }
  0x8f   : > { %1424 = vmatpush1.bf16.msra.mxu1 %v2258_v24  ;;  %v2048_v24 = vld [vmem:[%s2325_s19 + $0x4c] ss:$16 sps:$4 sm:$0xff]  }
  0x90   : > { %1425 = vmatprep.subr.bf16.mxu1 %v2062_v1  ;;  %1386 = vmatmul.mubr.bf16.gmra.mrb[52].mxu0 %v2040_v14  ;;  %v1262_v1 = vld [vmem:[%s2325_s19 + $0x68] sm:$0xff] }
  0x91   : > { %1393 = vmatprep.mubr.bf16.mxu0 %v2041_v18  ;;  %v1730_v33 = vcombine.high %v1262_v1, %v1262_v1 }
  0x93   : > { %1426 = vmatpush1.bf16.msra.mxu1 %v2275_v28  ;;  %v1729_v28 = vcombine.low %v1262_v1, %v1262_v1 }
  0x96   : > { %1442 = vmatmul.mubr.bf16.vlgmr.msra.gmra.mrb[48].mxu1 %v2037_v17 }
  0x97   : > { %1732 = vmatprep.mubr.msk.bf16.mxu1 %vm625_vm0, %v2043_v20 }
  0x98   : > { %1394 = vmatmul.mubr.bf16.gmra.mrb[56].mxu0 %v2045_v21 }
  0x99   : > { %1401 = vmatprep.mubr.bf16.mxu0 %v1728_v22 }
  0x9e   : > { %1450 = vmatmul.mubr.bf16.gmra.mrb[52].mxu1 %v2046_v26 }
  0x9f   : > { %1733 = vmatprep.mubr.msk.bf16.mxu1 %vm625_vm0, %v2048_v24 }
  0xa0   : > { %1402 = vmatmul.mubr.bf16.gmra.mrb[60].mxu0 %v1727_v31 }
  0xa6   : > { %1458 = vmatmul.mubr.bf16.gmra.mrb[56].mxu1 %v2051_v32 }
  0xa7   : > { %1734 = vmatprep.mubr.msk.bf16.mxu1 %vm625_vm0, %v1730_v33 }
  0xae   : > { %1466 = vmatmul.mubr.bf16.gmra.mrb[60].mxu1 %v1729_v28 }
  0xfa   : > { %v1788_v34 = vpop.f32.mrb[0].mxu0 }
  0xfb   : > { %v1789_v35 = vpop.f32.mrb[1].mxu0 }
  0xfc   : > { %v1790_v37 = vadd.f32 %v1789_v35, %v1788_v34  ;;  %v1791_v38 = vpop.f32.mrb[2].mxu0 }
  0xfd   : > { %v1792_v39 = vpop.f32.mrb[3].mxu0  ;;  %v736_v40 = vpop.f32.mrb[0].mxu1 }
  0xfe   : > { %v1793_v41 = vadd.f32 %v1792_v39, %v1791_v38  ;;  %v673_v42 = vadd.f32 %v1790_v37, %v2471_v36  ;;  %v738_v43 = vpop.f32.mrb[1].mxu1 }
  0xff   : > { %v739_v44 = vpop.f32.mrb[2].mxu1 }
 0x100   : > { %v2474_v45 = vadd.f32 %v736_v40, %v673_v42  ;;  %v676_v46 = vadd.f32 %v1793_v41, %v2471_v36  ;;  %v741_v47 = vpop.f32.mrb[3].mxu1 }
 0x102   : > { %v2477_v48 = vadd.f32 %v739_v44, %v676_v46  ;;  %v1794_v49 = vpop.f32.mrb[4].mxu0  ;;  %v766_v39 = vmax.f32 %v2474_v45, 0.0 }
 0x103   : > { %v1795_v50 = vpop.f32.mrb[5].mxu0 }
 0x104   : > { %v1796_v51 = vadd.f32 %v1795_v50, %v1794_v49  ;;  %v1797_v52 = vpop.f32.mrb[6].mxu0  ;;  %v767_v46 = vmax.f32 %v2477_v48, 0.0 }
 0x105   : > { %v1798_v53 = vpop.f32.mrb[7].mxu0  ;;  %v744_v54 = vpop.f32.mrb[4].mxu1 }
 0x106   : > { %v1799_v55 = vadd.f32 %v1798_v53, %v1797_v52  ;;  %v681_v56 = vadd.f32 %v1796_v51, %v2471_v36  ;;  %v746_v57 = vpop.f32.mrb[5].mxu1 }
 0x107   : > { %v747_v58 = vpop.f32.mrb[6].mxu1 }
 0x108   : > { %v2480_v59 = vadd.f32 %v744_v54, %v681_v56  ;;  %v684_v60 = vadd.f32 %v1799_v55, %v2471_v36  ;;  %v749_v61 = vpop.f32.mrb[7].mxu1 }
 0x10a   : > { %v2483_v62 = vadd.f32 %v747_v58, %v684_v60  ;;  %v1800_v63 = vpop.f32.mrb[8].mxu0  ;;  %v768_v61 = vmax.f32 %v2480_v59, 0.0 }
 0x10b   : > { %v1801_v23 = vpop.f32.mrb[9].mxu0 }
 0x10c   : > { %v1802_v25 = vadd.f32 %v1801_v23, %v1800_v63  ;;  %v1803_v27 = vpop.f32.mrb[10].mxu0 }
 0x10d   : > { %v1804_v0 = vpop.f32.mrb[11].mxu0  ;;  %v752_v29 = vpop.f32.mrb[8].mxu1 }
 0x10e   : > { %v1805_v3 = vadd.f32 %v1804_v0, %v1803_v27  ;;  %v689_v4 = vadd.f32 %v1802_v25, %v2471_v36  ;;  %v754_v6 = vpop.f32.mrb[9].mxu1  ;;  %v769_v0 = vmax.f32 %v2483_v62, 0.0 }
 0x10f   : > { %v755_v7 = vpop.f32.mrb[10].mxu1 }
 0x110   : > { %v2486_v30 = vadd.f32 %v752_v29, %v689_v4  ;;  %v692_v9 = vadd.f32 %v1805_v3, %v2471_v36  ;;  %v757_v2 = vpop.f32.mrb[11].mxu1 }
 0x112   : > { %v2489_v10 = vadd.f32 %v755_v7, %v692_v9  ;;  %v1806_v5 = vpop.f32.mrb[12].mxu0 }
 0x113   : > { %v1807_v12 = vpop.f32.mrb[13].mxu0 }
 0x114   : > { %v1808_v13 = vadd.f32 %v1807_v12, %v1806_v5  ;;  %v1809_v8 = vpop.f32.mrb[14].mxu0 }
 0x115   : > { %v760_v11 = vpop.f32.mrb[12].mxu1  ;;  %v1810_v15 = vpop.f32.mrb[15].mxu0 }
 0x116   : > { %v697_v16 = vadd.f32 %v1808_v13, %v2471_v36  ;;  %v762_v14 = vpop.f32.mrb[13].mxu1  ;;  %v770_v15 = vmax.f32 %v2486_v30, 0.0 }
 0x117   : > { %v763_v18 = vpop.f32.mrb[14].mxu1 }
 0x118   : > { %v2492_v17 = vadd.f32 %v760_v11, %v697_v16  ;;  %v764_v19 = vpop.f32.mrb[15].mxu1 }
 0x11a   : > { %v1828_v20 = vpop.f32.mrb[16].mxu0 }
 0x11b   : > { %v1829_v21 = vpop.f32.mrb[17].mxu0 }
 0x11c   : > { %v1830_v22 = vadd.f32 %v1829_v21, %v1828_v20  ;;  %v1831_v26 = vpop.f32.mrb[18].mxu0  ;;  %v771_v21 = vmax.f32 %v2489_v10, 0.0 }
 0x11d   : > { %v1832_v24 = vpop.f32.mrb[19].mxu0 }
 0x11e   : > { %v1833_v31 = vadd.f32 %v1832_v24, %v1831_v26  ;;  %v904_v1 = vadd.f32 %v1830_v22, %v2471_v36 }
 0x120   : > { %v907_v32 = vadd.f32 %v1833_v31, %v2471_v36 }
 0x121   : > { %v967_v33 = vpop.f32.mrb[16].mxu1 }
 0x122   : > { %v968_v28 = vadd.f32 %v967_v33, %v904_v1  ;;  %v969_v34 = vpop.f32.mrb[17].mxu1  ;;  %v1834_v35 = vpop.f32.mrb[20].mxu0 }
 0x123   : > { %v970_v37 = vpop.f32.mrb[18].mxu1  ;;  %v1835_v38 = vpop.f32.mrb[21].mxu0  ;;  %v772_v34 = vmax.f32 %v2492_v17, 0.0 }
 0x124   : > { %v997_v40 = vmax.f32 %v968_v28, 0.0  ;;  %v971_v41 = vadd.f32 %v970_v37, %v907_v32  ;;  %v972_v42 = vpop.f32.mrb[19].mxu1  ;;  %v1836_v43 = vadd.f32 %v1835_v38, %v1834_v35  ;;  %v1837_v44 = vpop.f32.mrb[22].mxu0 }
 0x125   : > { %v1838_v47 = vpop.f32.mrb[23].mxu0 }
 0x126   : > { %v2498_v49 = vmax.f32 %v766_v39, %v997_v40  ;;  %v998_v50 = vmax.f32 %v971_v41, 0.0  ;;  %v1839_v51 = vadd.f32 %v1838_v47, %v1837_v44  ;;  %v912_v52 = vadd.f32 %v1836_v43, %v2471_v36 }
 0x128   : > { %v2501_v53 = vmax.f32 %v767_v46, %v998_v50  ;;  %v915_v54 = vadd.f32 %v1839_v51, %v2471_v36 }
 0x129   : > { %v975_v55 = vpop.f32.mrb[20].mxu1 }
 0x12a   : > { %v976_v45 = vadd.f32 %v975_v55, %v912_v52  ;;  %v977_v56 = vpop.f32.mrb[21].mxu1  ;;  %v1840_v57 = vpop.f32.mrb[24].mxu0 }
 0x12b   : > { %v978_v58 = vpop.f32.mrb[22].mxu1  ;;  %v1841_v60 = vpop.f32.mrb[25].mxu0 }
 0x12c   : > { %v999_v48 = vmax.f32 %v976_v45, 0.0  ;;  %v979_v63 = vadd.f32 %v978_v58, %v915_v54  ;;  %v1842_v23 = vadd.f32 %v1841_v60, %v1840_v57  ;;  %v1843_v25 = vpop.f32.mrb[26].mxu0  ;;  %v980_v27 = vpop.f32.mrb[23].mxu1 }
 0x12d   : > { %v1844_v29 = vpop.f32.mrb[27].mxu0 }
 0x12e   : > { %v2506_v3 = vmax.f32 %v768_v61, %v999_v48  ;;  %v1000_v4 = vmax.f32 %v979_v63, 0.0  ;;  %v1845_v6 = vadd.f32 %v1844_v29, %v1843_v25  ;;  %v920_v7 = vadd.f32 %v1842_v23, %v2471_v36 }
 0x130   : > { %v2509_v9 = vmax.f32 %v769_v0, %v1000_v4  ;;  %v923_v2 = vadd.f32 %v1845_v6, %v2471_v36 }
 0x131   : > { %v983_v5 = vpop.f32.mrb[24].mxu1 }
 0x132   : > { %v984_v59 = vadd.f32 %v983_v5, %v920_v7  ;;  %v985_v12 = vpop.f32.mrb[25].mxu1  ;;  %v1846_v13 = vpop.f32.mrb[28].mxu0 }
 0x133   : > { %v986_v8 = vpop.f32.mrb[26].mxu1  ;;  %v1847_v11 = vpop.f32.mrb[29].mxu0 }
 0x134   : > { %v1001_v62 = vmax.f32 %v984_v59, 0.0  ;;  %v987_v16 = vadd.f32 %v986_v8, %v923_v2  ;;  %v1848_v14 = vadd.f32 %v1847_v11, %v1846_v13  ;;  %v988_v18 = vpop.f32.mrb[27].mxu1  ;;  %v1849_v19 = vpop.f32.mrb[30].mxu0 }
 0x135   : > { %v1850_v20 = vpop.f32.mrb[31].mxu0 }
 0x136   : > { %v2514_v22 = vmax.f32 %v770_v15, %v1001_v62  ;;  %v1002_v26 = vmax.f32 %v987_v16, 0.0  ;;  %v928_v24 = vadd.f32 %v1848_v14, %v2471_v36 }
 0x138   : > { %v2517_v31 = vmax.f32 %v771_v21, %v1002_v26 }
 0x139   : > { %v991_v1 = vpop.f32.mrb[28].mxu1 }
 0x13a   : > { %v992_v32 = vadd.f32 %v991_v1, %v928_v24  ;;  %v993_v33 = vpop.f32.mrb[29].mxu1 }
 0x13b   : > { %v994_v28 = vpop.f32.mrb[30].mxu1  ;;  %v1868_v30 = vpop.f32.mrb[32].mxu0 }
 0x13c   : > { %v1003_v35 = vmax.f32 %v992_v32, 0.0  ;;  %v995_v37 = vpop.f32.mrb[31].mxu1  ;;  %v1869_v38 = vpop.f32.mrb[33].mxu0 }
 0x13d   : > { %v1870_v39 = vadd.f32 %v1869_v38, %v1868_v30  ;;  %v1871_v40 = vpop.f32.mrb[34].mxu0 }
 0x13e   : > { %v2520_v10 = vmax.f32 %v772_v34, %v1003_v35  ;;  %v1872_v41 = vpop.f32.mrb[35].mxu0 }
 0x13f   : > { %v1873_v42 = vadd.f32 %v1872_v41, %v1871_v40  ;;  %v1142_v43 = vadd.f32 %v1870_v39, %v2471_v36 }
 0x141   : > { %v1145_v46 = vadd.f32 %v1873_v42, %v2471_v36 }
 0x143   : > { %v1874_v44 = vpop.f32.mrb[36].mxu0 }
 0x144   : > { %v1875_v47 = vpop.f32.mrb[37].mxu0 }
 0x145   : > { %v1205_v50 = vpop.f32.mrb[32].mxu1  ;;  %v1876_v51 = vadd.f32 %v1875_v47, %v1874_v44  ;;  %v1877_v52 = vpop.f32.mrb[38].mxu0 }
 0x146   : > { %v1206_v54 = vadd.f32 %v1205_v50, %v1142_v43  ;;  %v1207_v17 = vpop.f32.mrb[33].mxu1  ;;  %v1878_v55 = vpop.f32.mrb[39].mxu0 }
 0x147   : > { %v1208_v45 = vpop.f32.mrb[34].mxu1  ;;  %v1879_v56 = vadd.f32 %v1878_v55, %v1877_v52  ;;  %v1150_v63 = vadd.f32 %v1876_v51, %v2471_v36 }
 0x148   : > { %v1235_v57 = vmax.f32 %v1206_v54, 0.0  ;;  %v1209_v58 = vadd.f32 %v1208_v45, %v1145_v46  ;;  %v1210_v60 = vpop.f32.mrb[35].mxu1 }
 0x149   : > { %v1153_v27 = vadd.f32 %v1879_v56, %v2471_v36 }
 0x14a   : > { %v2525_v61 = vmax.f32 %v2498_v49, %v1235_v57  ;;  %v1236_v48 = vmax.f32 %v1209_v58, 0.0 }
 0x14b   : > { %v1880_v23 = vpop.f32.mrb[40].mxu0 }
 0x14c   : > { %v2529_v25 = vmax.f32 %v2501_v53, %v1236_v48  ;;  %v1881_v0 = vpop.f32.mrb[41].mxu0 }
 0x14d   : > { %v1213_v29 = vpop.f32.mrb[36].mxu1  ;;  %v1882_v4 = vadd.f32 %v1881_v0, %v1880_v23  ;;  %v1883_v6 = vpop.f32.mrb[42].mxu0 }
 0x14e   : > { %v1214_v7 = vadd.f32 %v1213_v29, %v1150_v63  ;;  %v1215_v2 = vpop.f32.mrb[37].mxu1  ;;  %v1884_v5 = vpop.f32.mrb[43].mxu0 }
 0x14f   : > { %v1216_v59 = vpop.f32.mrb[38].mxu1  ;;  %v1885_v12 = vadd.f32 %v1884_v5, %v1883_v6  ;;  %v1158_v53 = vadd.f32 %v1882_v4, %v2471_v36 }
 0x150   : > { %v1237_v49 = vmax.f32 %v1214_v7, 0.0  ;;  %v1217_v13 = vadd.f32 %v1216_v59, %v1153_v27  ;;  %v1218_v8 = vpop.f32.mrb[39].mxu1 }
 0x151   : > { %v1161_v14 = vadd.f32 %v1885_v12, %v2471_v36 }
 0x152   : > { %v2533_v11 = vmax.f32 %v2506_v3, %v1237_v49  ;;  %v1238_v15 = vmax.f32 %v1217_v13, 0.0 }
 0x153   : > { %v1886_v62 = vpop.f32.mrb[44].mxu0 }
 0x154   : > { %v2537_v16 = vmax.f32 %v2509_v9, %v1238_v15  ;;  %v1887_v18 = vpop.f32.mrb[45].mxu0 }
 0x155   : > { %v1221_v19 = vpop.f32.mrb[40].mxu1  ;;  %v1888_v20 = vadd.f32 %v1887_v18, %v1886_v62  ;;  %v1889_v21 = vpop.f32.mrb[46].mxu0 }
 0x156   : > { %v1222_v26 = vadd.f32 %v1221_v19, %v1158_v53  ;;  %v1223_v24 = vpop.f32.mrb[41].mxu1  ;;  %v1890_v1 = vpop.f32.mrb[47].mxu0 }
 0x157   : > { %v1224_v32 = vpop.f32.mrb[42].mxu1  ;;  %v1166_v9 = vadd.f32 %v1888_v20, %v2471_v36 }
 0x158   : > { %v1239_v33 = vmax.f32 %v1222_v26, 0.0  ;;  %v1225_v3 = vadd.f32 %v1224_v32, %v1161_v14  ;;  %v1226_v28 = vpop.f32.mrb[43].mxu1 }
 0x15a   : > { %v2541_v30 = vmax.f32 %v2514_v22, %v1239_v33  ;;  %v1240_v34 = vmax.f32 %v1225_v3, 0.0 }
 0x15b   : > { %v1908_v35 = vpop.f32.mrb[48].mxu0 }
 0x15c   : > { %v2545_v37 = vmax.f32 %v2517_v31, %v1240_v34  ;;  %v1909_v38 = vpop.f32.mrb[49].mxu0 }
 0x15d   : > { %v1229_v39 = vpop.f32.mrb[44].mxu1  ;;  %v1910_v40 = vadd.f32 %v1909_v38, %v1908_v35  ;;  %v1911_v41 = vpop.f32.mrb[50].mxu0 }
 0x15e   : > { %v1230_v42 = vadd.f32 %v1229_v39, %v1166_v9  ;;  %v1231_v43 = vpop.f32.mrb[45].mxu1  ;;  %v1912_v44 = vpop.f32.mrb[51].mxu0 }
 0x15f   : > { %v1232_v46 = vpop.f32.mrb[46].mxu1  ;;  %v1913_v47 = vadd.f32 %v1912_v44, %v1911_v41  ;;  %v1380_v31 = vadd.f32 %v1910_v40, %v2471_v36 }
 0x160   : > { %v1241_v50 = vmax.f32 %v1230_v42, 0.0  ;;  %v1233_v51 = vpop.f32.mrb[47].mxu1 }
 0x161   : > { %v1383_v48 = vadd.f32 %v1913_v47, %v2471_v36 }
 0x162   : > { %v2548_v22 = vmax.f32 %v2520_v10, %v1241_v50 }
 0x163   : > { %v1914_v52 = vpop.f32.mrb[52].mxu0 }
 0x164   : > { %v1915_v54 = vpop.f32.mrb[53].mxu0 }
 0x165   : > { %v1916_v17 = vadd.f32 %v1915_v54, %v1914_v52  ;;  %v1917_v55 = vpop.f32.mrb[54].mxu0 }
 0x166   : > { %v1918_v45 = vpop.f32.mrb[55].mxu0 }
 0x167   : > { %v1919_v56 = vadd.f32 %v1918_v45, %v1917_v55  ;;  %v1388_v5 = vadd.f32 %v1916_v17, %v2471_v36 }
 0x169   : > { %v1443_v57 = vpop.f32.mrb[48].mxu1 }
 0x16a   : > { %v1444_v58 = vadd.f32 %v1443_v57, %v1380_v31  ;;  %v1445_v60 = vpop.f32.mrb[49].mxu1 }
 0x16b   : > { %v1446_v63 = vpop.f32.mrb[50].mxu1  ;;  %v1920_v23 = vpop.f32.mrb[56].mxu0 }
 0x16c   : > { %v1473_v27 = vmax.f32 %v1444_v58, 0.0  ;;  %v1447_v0 = vadd.f32 %v1446_v63, %v1383_v48  ;;  %v1448_v10 = vpop.f32.mrb[51].mxu1  ;;  %v1921_v29 = vpop.f32.mrb[57].mxu0 }
 0x16d   : > { %v1922_v4 = vadd.f32 %v1921_v29, %v1920_v23  ;;  %v1923_v6 = vpop.f32.mrb[58].mxu0 }
 0x16e   : > { %v1480_v7 = vmax.f32 %v2525_v61, %v1473_v27  ;;  %v1474_v2 = vmax.f32 %v1447_v0, 0.0  ;;  %v1924_v59 = vpop.f32.mrb[59].mxu0  ;;  %v1391_v61 = vadd.f32 %v1919_v56, %v2471_v36 }
 0x16f   : > { %v1925_v12 = vadd.f32 %v1924_v59, %v1923_v6  ;;  %v1396_v32 = vadd.f32 %v1922_v4, %v2471_v36 }
 0x170   : > { %v1481_v49 = vmax.f32 %v2529_v25, %v1474_v2 }
 0x171   : > { %v1451_v13 = vpop.f32.mrb[52].mxu1  ;;  %v1399_v38 = vadd.f32 %v1925_v12, %v2471_v36 }
 0x172   : > { %v1758_v8 = vpack.c.bf16 %v1481_v49, %v1480_v7  ;;  %v1452_v15 = vadd.f32 %v1451_v13, %v1388_v5  ;;  %v1453_v53 = vpop.f32.mrb[53].mxu1 }
 0x173   : > { %v1454_v62 = vpop.f32.mrb[54].mxu1  ;;  %v1926_v14 = vpop.f32.mrb[60].mxu0 }
 0x174   : > { %1759 = vst [vmem:[%s2559_s25] sm:$0xff] %v1758_v8   ;;  %v1475_v18 = vmax.f32 %v1452_v15, 0.0  ;;  %v1455_v19 = vadd.f32 %v1454_v62, %v1391_v61  ;;  %v1456_v20 = vpop.f32.mrb[55].mxu1  ;;  %v1927_v25 = vpop.f32.mrb[61].mxu0 }
 0x175   : > { %v1928_v21 = vadd.f32 %v1927_v25, %v1926_v14  ;;  %v1929_v26 = vpop.f32.mrb[62].mxu0 }
 0x176   : > { %v1482_v24 = vmax.f32 %v2533_v11, %v1475_v18  ;;  %v1476_v1 = vmax.f32 %v1455_v19, 0.0  ;;  %v1930_v33 = vpop.f32.mrb[63].mxu0 }
 0x177   : > { %v1404_v44 = vadd.f32 %v1928_v21, %v2471_v36 }
 0x178   : > { %v1483_v3 = vmax.f32 %v2537_v16, %v1476_v1 }
 0x179   : > { %v1459_v28 = vpop.f32.mrb[56].mxu1 }
 0x17a   : > { %v1763_v34 = vpack.c.bf16 %v1483_v3, %v1482_v24  ;;  %v1460_v9 = vadd.f32 %v1459_v28, %v1396_v32  ;;  %v1461_v35 = vpop.f32.mrb[57].mxu1 }
 0x17b   : > { %v1462_v39 = vpop.f32.mrb[58].mxu1 }
 0x17c   : > { %1770 = vst [vmem:[%s2559_s25 + $0x8] sm:$0xff] %v1763_v34   ;;  %v1477_v40 = vmax.f32 %v1460_v9, 0.0  ;;  %v1463_v41 = vadd.f32 %v1462_v39, %v1399_v38  ;;  %v1464_v42 = vpop.f32.mrb[59].mxu1 }
 0x17e   : > { %v1484_v11 = vmax.f32 %v2541_v30, %v1477_v40  ;;  %v1478_v43 = vmax.f32 %v1463_v41, 0.0 }
 0x180   : > { %v1485_v16 = vmax.f32 %v2545_v37, %v1478_v43 }
 0x181   : > { %v1467_v46 = vpop.f32.mrb[60].mxu1 }
 0x182   : > { %v1768_v47 = vpack.c.bf16 %v1485_v16, %v1484_v11  ;;  %v1468_v50 = vadd.f32 %v1467_v46, %v1404_v44  ;;  %v1469_v51 = vpop.f32.mrb[61].mxu1 }
 0x183   : > { %v1470_v52 = vpop.f32.mrb[62].mxu1 }
 0x184   : > { %1771 = vst [vmem:[%s2559_s25 + $0x10] sm:$0xff] %v1768_v47   ;;  %v1479_v54 = vmax.f32 %v1468_v50, 0.0  ;;  %v1471_v17 = vpop.f32.mrb[63].mxu1 }
 0x186   : > { %v1486_v55 = vmax.f32 %v2548_v22, %v1479_v54 }
 0x188   : > { %v1754_v31 = vpack.c.bf16 %v1486_v55, %v1486_v55 }
 0x18a   : > { %1522 = vst [vmem:[%s2559_s25 + $0x18] sm:$0xf] %v1754_v31 }
 0x18b PF: > { %s16_s21 = sadd.s32 1, %s2060_s21  }
 0x18c   : > { %p13_p4 = scmp.ge.s32.totalorder %s16_s21, 4  }
 0x18e   :  { %15 = sbr.rel (!%p13_p4) target bundleno = 1 (0x1), region = 83 }

// kernel: _lambda_.5
= control target key start
LH: loop header
LB: loop body
LE: loop exit
PB: predicated region body
PF: predicated region fallthrough
CT: control target
= control target key end

     0   :  { %vm1517_vm0 = vmmov 0   ;;  %vm858_vm1 = vcmask 261120   ;;  %s1859_s1 = inlined_call_operand.vmem [shape: bf16[1568,128], index: 1, kind: input, shape index: {}]   ;;  %s1860_s0 = inlined_call_operand.vmem [shape: bf16[8,1568], index: 0, kind: input, shape index: {}]   ;;  %s1861_s2 = inlined_call_operand.vmem [shape: f32[1,128], index: 2, kind: input, shape index: {}]   ;;  %s1862_s3 = inlined_call_operand.vmem [shape: f32[8,128], index: 3, kind: output, shape index: {}]  }
   0x1   :  { %v1405_v0 = vld [vmem:[%s1859_s1 + $0x40] sm:$0xff]   ;;  %v1409_v4 = vld [vmem:[%s1859_s1 + $0x48] sm:$0xff]   ;;  %v1413_v8 = vld [vmem:[%s1859_s1 + $0x50] sm:$0xff]  }
   0x2   :  { %v1406_v1 = vld [vmem:[%s1859_s1] sm:$0xff]   ;;  %1260 = vmatprep.subr.bf16.mxu0 %v1405_v0  ;;  %v1410_v5 = vld [vmem:[%s1859_s1 + $0x8] sm:$0xff]   ;;  %v1414_v9 = vld [vmem:[%s1859_s1 + $0x10] sm:$0xff]  }
   0x3   :  { %v1407_v2 = vld [vmem:[%s1859_s1 + $0xc0] sm:$0xff]   ;;  %1261 = vmatpush3.bf16.msra.mxu0 %v1406_v1  ;;  %v1411_v6 = vld [vmem:[%s1859_s1 + $0xc8] sm:$0xff]   ;;  %v1415_v10 = vld [vmem:[%s1859_s1 + $0xd0] sm:$0xff]  }
   0x4   :  { %v1408_v3 = vld [vmem:[%s1859_s1 + $0x80] sm:$0xff]   ;;  %1282 = vmatprep.subr.bf16.mxu1 %v1407_v2  ;;  %1262 = vmatprep.subr.bf16.mxu0 %v1409_v4  ;;  %v1412_v7 = vld [vmem:[%s1859_s1 + $0x88] sm:$0xff]   ;;  %v1416_v11 = vld [vmem:[%s1859_s1 + $0x90] sm:$0xff]  }
   0x5   :  { %1283 = vmatpush3.bf16.msra.mxu1 %v1408_v3  ;;  %v1417_v12 = vld [vmem:[%s1859_s1 + $0x58] sm:$0xff]   ;;  %v1421_v16 = vld [vmem:[%s1859_s1 + $0x60] sm:$0xff]   ;;  %v1425_v20 = vld [vmem:[%s1859_s1 + $0x68] sm:$0xff]  }
   0x6   :  { %1284 = vmatprep.subr.bf16.mxu1 %v1411_v6  ;;  %v1418_v13 = vld [vmem:[%s1859_s1 + $0x18] sm:$0xff]   ;;  %v1422_v17 = vld [vmem:[%s1859_s1 + $0x20] sm:$0xff]   ;;  %v1426_v21 = vld [vmem:[%s1859_s1 + $0x28] sm:$0xff]  }
   0x7   :  { %1263 = vmatpush3.bf16.msra.mxu0 %v1410_v5  ;;  %v1419_v14 = vld [vmem:[%s1859_s1 + $0xd8] sm:$0xff]   ;;  %v1423_v18 = vld [vmem:[%s1859_s1 + $0xe0] sm:$0xff]   ;;  %v1427_v22 = vld [vmem:[%s1859_s1 + $0xe8] sm:$0xff]  }
   0x8   :  { %1264 = vmatprep.subr.bf16.mxu0 %v1413_v8  ;;  %v1420_v15 = vld [vmem:[%s1859_s1 + $0x98] sm:$0xff]   ;;  %v1424_v19 = vld [vmem:[%s1859_s1 + $0xa0] sm:$0xff]   ;;  %v1428_v23 = vld [vmem:[%s1859_s1 + $0xa8] sm:$0xff]  }
   0x9   :  { %1285 = vmatpush3.bf16.msra.mxu1 %v1412_v7  ;;  %v1429_v24 = vld [vmem:[%s1859_s1 + $0x70] sm:$0xff]   ;;  %v1433_v28 = vld [vmem:[%s1859_s1 + $0x78] sm:$0xff]   ;;  %v15_v32 = vld [vmem:[%s1860_s0] sm:$0xff] }
   0xa   :  { %1286 = vmatprep.subr.bf16.mxu1 %v1415_v10  ;;  %v1430_v25 = vld [vmem:[%s1859_s1 + $0x30] sm:$0xff]   ;;  %v1434_v29 = vld [vmem:[%s1859_s1 + $0x38] sm:$0xff]   ;;  %v1148_v33 = vcombine.low %v15_v32, %v15_v32  ;;  %v1149_v34 = vcombine.high %v15_v32, %v15_v32  ;;  %v1439_v35 = vld [vmem:[%s1859_s1 + $0x140] sm:$0xff]  }
   0xb   :  { %1265 = vmatpush3.bf16.msra.mxu0 %v1414_v9  ;;  %v1431_v26 = vld [vmem:[%s1859_s1 + $0xf0] sm:$0xff]   ;;  %v1435_v30 = vld [vmem:[%s1859_s1 + $0xf8] sm:$0xff]   ;;  %v16_v36 = vld [vmem:[%s1860_s0 + $0x8] sm:$0xff] }
   0xc   :  { %1266 = vmatprep.subr.bf16.mxu0 %v1417_v12  ;;  %v1432_v27 = vld [vmem:[%s1859_s1 + $0xb0] sm:$0xff]   ;;  %v1436_v31 = vld [vmem:[%s1859_s1 + $0xb8] sm:$0xff]   ;;  %v1150_v37 = vcombine.low %v16_v36, %v16_v36  ;;  %v1151_v38 = vcombine.high %v16_v36, %v16_v36  ;;  %v1442_v39 = vld [vmem:[%s1859_s1 + $0x100] sm:$0xff]   ;;  %894 = vmatprep.mubr.bf16.mxu0 %v1149_v34 }
   0xd   :  { %1287 = vmatpush3.bf16.msra.mxu1 %v1416_v11  ;;  %v1443_v40 = vld [vmem:[%s1859_s1 + $0x1c0] sm:$0xff]   ;;  %v1445_v42 = vld [vmem:[%s1859_s1 + $0x148] sm:$0xff]   ;;  %v1449_v46 = vld [vmem:[%s1859_s1 + $0x150] sm:$0xff]  }
   0xe   :  { %1288 = vmatprep.subr.bf16.mxu1 %v1419_v14  ;;  %934 = vmatprep.mubr.bf16.mxu1 %v1151_v38  ;;  %v1444_v41 = vld [vmem:[%s1859_s1 + $0x180] sm:$0xff]   ;;  %v1446_v43 = vld [vmem:[%s1859_s1 + $0x108] sm:$0xff]   ;;  %v1450_v47 = vld [vmem:[%s1859_s1 + $0x110] sm:$0xff]  }
   0xf   :  { %1267 = vmatpush3.bf16.msra.mxu0 %v1418_v13  ;;  %v1447_v44 = vld [vmem:[%s1859_s1 + $0x1c8] sm:$0xff]   ;;  %v1451_v48 = vld [vmem:[%s1859_s1 + $0x1d0] sm:$0xff]   ;;  %v1453_v50 = vld [vmem:[%s1859_s1 + $0x158] sm:$0xff]  }
  0x10   :  { %1268 = vmatprep.subr.bf16.mxu0 %v1421_v16  ;;  %v1448_v45 = vld [vmem:[%s1859_s1 + $0x188] sm:$0xff]   ;;  %v1452_v49 = vld [vmem:[%s1859_s1 + $0x190] sm:$0xff]   ;;  %v1454_v51 = vld [vmem:[%s1859_s1 + $0x118] sm:$0xff]  }
  0x11   :  { %1289 = vmatpush3.bf16.msra.mxu1 %v1420_v15  ;;  %v1455_v52 = vld [vmem:[%s1859_s1 + $0x1d8] sm:$0xff]   ;;  %v1457_v54 = vld [vmem:[%s1859_s1 + $0x160] sm:$0xff]   ;;  %v1461_v58 = vld [vmem:[%s1859_s1 + $0x168] sm:$0xff]  }
  0x12   :  { %1290 = vmatprep.subr.bf16.mxu1 %v1423_v18  ;;  %v1456_v53 = vld [vmem:[%s1859_s1 + $0x198] sm:$0xff]   ;;  %v1458_v55 = vld [vmem:[%s1859_s1 + $0x120] sm:$0xff]   ;;  %v1462_v59 = vld [vmem:[%s1859_s1 + $0x128] sm:$0xff]  }
  0x13   :  { %1269 = vmatpush3.bf16.msra.mxu0 %v1422_v17  ;;  %v1459_v56 = vld [vmem:[%s1859_s1 + $0x1e0] sm:$0xff]   ;;  %v1463_v60 = vld [vmem:[%s1859_s1 + $0x1e8] sm:$0xff]   ;;  %v1465_v62 = vld [vmem:[%s1859_s1 + $0x170] sm:$0xff]  }
  0x14   :  { %1270 = vmatprep.subr.bf16.mxu0 %v1425_v20  ;;  %v1460_v57 = vld [vmem:[%s1859_s1 + $0x1a0] sm:$0xff]   ;;  %v1464_v61 = vld [vmem:[%s1859_s1 + $0x1a8] sm:$0xff]   ;;  %v1466_v63 = vld [vmem:[%s1859_s1 + $0x130] sm:$0xff]  }
  0x15   :  { %1291 = vmatpush3.bf16.msra.mxu1 %v1424_v19  ;;  %v1467_v0 = vld [vmem:[%s1859_s1 + $0x1f0] sm:$0xff]   ;;  %v1469_v2 = vld [vmem:[%s1859_s1 + $0x178] sm:$0xff]   ;;  %v1475_v9 = vld [vmem:[%s1859_s1 + $0x240] sm:$0xff]  }
  0x16   :  { %1292 = vmatprep.subr.bf16.mxu1 %v1427_v22  ;;  %v1468_v1 = vld [vmem:[%s1859_s1 + $0x1b0] sm:$0xff]   ;;  %v1470_v3 = vld [vmem:[%s1859_s1 + $0x138] sm:$0xff]   ;;  %v1478_v13 = vld [vmem:[%s1859_s1 + $0x200] sm:$0xff]  }
  0x17   :  { %1271 = vmatpush3.bf16.msra.mxu0 %v1426_v21  ;;  %v1471_v4 = vld [vmem:[%s1859_s1 + $0x1f8] sm:$0xff]   ;;  %v17_v6 = vld [vmem:[%s1860_s0 + $0x10] sm:$0xff]  ;;  %v1479_v14 = vld [vmem:[%s1859_s1 + $0x2c0] sm:$0xff]  }
  0x18   :  { %1272 = vmatprep.subr.bf16.mxu0 %v1429_v24  ;;  %v1472_v5 = vld [vmem:[%s1859_s1 + $0x1b8] sm:$0xff]   ;;  %v1152_v7 = vcombine.low %v17_v6, %v17_v6  ;;  %v1153_v8 = vcombine.high %v17_v6, %v17_v6  ;;  %v1480_v15 = vld [vmem:[%s1859_s1 + $0x280] sm:$0xff]   ;;  %v1481_v16 = vld [vmem:[%s1859_s1 + $0x248] sm:$0xff]  }
  0x19   :  { %1293 = vmatpush3.bf16.msra.mxu1 %v1428_v23  ;;  %v18_v10 = vld [vmem:[%s1860_s0 + $0x18] sm:$0xff]  ;;  %v1482_v17 = vld [vmem:[%s1859_s1 + $0x208] sm:$0xff]   ;;  %v1485_v20 = vld [vmem:[%s1859_s1 + $0x250] sm:$0xff]  }
  0x1a   :  { %1294 = vmatprep.subr.bf16.mxu1 %v1431_v26  ;;  %v1154_v11 = vcombine.low %v18_v10, %v18_v10  ;;  %v1155_v12 = vcombine.high %v18_v10, %v18_v10  ;;  %v1483_v18 = vld [vmem:[%s1859_s1 + $0x2c8] sm:$0xff]   ;;  %v1486_v21 = vld [vmem:[%s1859_s1 + $0x210] sm:$0xff]   ;;  %v1489_v24 = vld [vmem:[%s1859_s1 + $0x258] sm:$0xff]  }
  0x1b   :  { %1273 = vmatpush3.bf16.msra.mxu0 %v1430_v25  ;;  %v1484_v19 = vld [vmem:[%s1859_s1 + $0x288] sm:$0xff]   ;;  %v1487_v22 = vld [vmem:[%s1859_s1 + $0x2d0] sm:$0xff]   ;;  %v1490_v25 = vld [vmem:[%s1859_s1 + $0x218] sm:$0xff]  }
  0x1c   :  { %1274 = vmatprep.subr.bf16.mxu0 %v1433_v28  ;;  %v1488_v23 = vld [vmem:[%s1859_s1 + $0x290] sm:$0xff]   ;;  %v1491_v26 = vld [vmem:[%s1859_s1 + $0x2d8] sm:$0xff]   ;;  %v1493_v28 = vld [vmem:[%s1859_s1 + $0x260] sm:$0xff]  }
  0x1d   :  { %1295 = vmatpush3.bf16.msra.mxu1 %v1432_v27  ;;  %v1492_v27 = vld [vmem:[%s1859_s1 + $0x298] sm:$0xff]   ;;  %v1497_v32 = vld [vmem:[%s1859_s1 + $0x268] sm:$0xff]   ;;  %v1501_v36 = vld [vmem:[%s1859_s1 + $0x270] sm:$0xff]  }
  0x1e   :  { %1296 = vmatprep.subr.bf16.mxu1 %v1435_v30  ;;  %v1495_v30 = vld [vmem:[%s1859_s1 + $0x2e0] sm:$0xff]   ;;  %v1499_v34 = vld [vmem:[%s1859_s1 + $0x2e8] sm:$0xff]   ;;  %v1503_v38 = vld [vmem:[%s1859_s1 + $0x2f0] sm:$0xff]  }
  0x1f   :  { %1275 = vmatpush3.bf16.msra.mxu0 %v1434_v29  ;;  %v1494_v29 = vld [vmem:[%s1859_s1 + $0x220] sm:$0xff]  }
  0x20   :  { %1304 = vmatprep.subr.bf16.mxu0 %v1439_v35  ;;  %v1500_v35 = vld [vmem:[%s1859_s1 + $0x2a8] sm:$0xff]  }
  0x21   :  { %1297 = vmatpush3.bf16.msra.mxu1 %v1436_v31  ;;  %v1496_v31 = vld [vmem:[%s1859_s1 + $0x2a0] sm:$0xff]  }
  0x22   :  { %895 = vmatmul.mubr.bf16.vlgmr.msra.gmra.mrb[0].mxu0 %v1148_v33  ;;  %1326 = vmatprep.subr.bf16.mxu1 %v1443_v40  ;;  %v1498_v33 = vld [vmem:[%s1859_s1 + $0x228] sm:$0xff]   ;;  %v1505_v40 = vld [vmem:[%s1859_s1 + $0x278] sm:$0xff]  }
  0x23   :  { %1305 = vmatpush3.bf16.msra.mxu0 %v1442_v39  ;;  %974 = vmatprep.mubr.bf16.mxu0 %v1153_v8  ;;  %v1504_v39 = vld [vmem:[%s1859_s1 + $0x2b0] sm:$0xff]  }
  0x24   :  { %935 = vmatmul.mubr.bf16.vlgmr.msra.gmra.mrb[0].mxu1 %v1150_v37  ;;  %1306 = vmatprep.subr.bf16.mxu0 %v1445_v42  ;;  %v1502_v37 = vld [vmem:[%s1859_s1 + $0x230] sm:$0xff]   ;;  %v1507_v42 = vld [vmem:[%s1859_s1 + $0x2f8] sm:$0xff]  }
  0x25   :  { %1327 = vmatpush3.bf16.msra.mxu1 %v1444_v41  ;;  %1014 = vmatprep.mubr.bf16.mxu1 %v1155_v12  ;;  %v1506_v41 = vld [vmem:[%s1859_s1 + $0x238] sm:$0xff]  }
  0x26   :  { %1328 = vmatprep.subr.bf16.mxu1 %v1447_v44  ;;  %v19_v44 = vld [vmem:[%s1860_s0 + $0x20] sm:$0xff] }
  0x27   :  { %1307 = vmatpush3.bf16.msra.mxu0 %v1446_v43  ;;  %v1508_v43 = vld [vmem:[%s1859_s1 + $0x2b8] sm:$0xff]  }
  0x28   :  { %1308 = vmatprep.subr.bf16.mxu0 %v1449_v46  ;;  %v1156_v46 = vcombine.low %v19_v44, %v19_v44 }
  0x29   :  { %1329 = vmatpush3.bf16.msra.mxu1 %v1448_v45  ;;  %v20_v45 = vld [vmem:[%s1860_s0 + $0x28] sm:$0xff] }
  0x2a   :  { %1330 = vmatprep.subr.bf16.mxu1 %v1451_v48  ;;  %v1158_v48 = vcombine.low %v20_v45, %v20_v45 }
  0x2b   :  { %1309 = vmatpush3.bf16.msra.mxu0 %v1450_v47  ;;  %v1157_v47 = vcombine.high %v19_v44, %v19_v44 }
  0x2c   :  { %1310 = vmatprep.subr.bf16.mxu0 %v1453_v50  ;;  %v1513_v50 = vld [vmem:[%s1859_s1 + $0x300] sm:$0xff]  }
  0x2d   :  { %1331 = vmatpush3.bf16.msra.mxu1 %v1452_v49  ;;  %v1159_v49 = vcombine.high %v20_v45, %v20_v45 }
  0x2e   :  { %1332 = vmatprep.subr.bf16.mxu1 %v1455_v52  ;;  %v1514_v52 = vld [vmem:[%s1859_s1 + $0x308] sm:$0xff]  }
  0x2f   :  { %1311 = vmatpush3.bf16.msra.mxu0 %v1454_v51  ;;  %v1516_v51 = vmov 0.0  }
  0x30   :  { %1312 = vmatprep.subr.bf16.mxu0 %v1457_v54 }
  0x31   :  { %1333 = vmatpush3.bf16.msra.mxu1 %v1456_v53  ;;  %v1515_v53 = vld [vmem:[%s1860_s0 + $0x30] ss:$0 sps:$4 sm:$0xff]  }
  0x32   :  { %1334 = vmatprep.subr.bf16.mxu1 %v1459_v56 }
  0x33   :  { %1313 = vmatpush3.bf16.msra.mxu0 %v1458_v55  ;;  %v1147_v55 = vld [vmem:[%s1861_s2] ss:$0 sm:$0xff] }
  0x34   :  { %1314 = vmatprep.subr.bf16.mxu0 %v1461_v58 }
  0x35   :  { %1335 = vmatpush3.bf16.msra.mxu1 %v1460_v57 }
  0x36   :  { %1336 = vmatprep.subr.bf16.mxu1 %v1463_v60 }
  0x37   :  { %1315 = vmatpush3.bf16.msra.mxu0 %v1462_v59 }
  0x38   :  { %1316 = vmatprep.subr.bf16.mxu0 %v1465_v62 }
  0x39   :  { %1337 = vmatpush3.bf16.msra.mxu1 %v1464_v61 }
  0x3a   :  { %1338 = vmatprep.subr.bf16.mxu1 %v1467_v0 }
  0x3b   :  { %1317 = vmatpush3.bf16.msra.mxu0 %v1466_v63 }
  0x3c   :  { %1318 = vmatprep.subr.bf16.mxu0 %v1469_v2 }
  0x3d   :  { %1339 = vmatpush3.bf16.msra.mxu1 %v1468_v1 }
  0x3e   :  { %1340 = vmatprep.subr.bf16.mxu1 %v1471_v4 }
  0x3f   :  { %1319 = vmatpush3.bf16.msra.mxu0 %v1470_v3 }
  0x40   :  { %1348 = vmatprep.subr.bf16.mxu0 %v1475_v9 }
  0x41   :  { %1341 = vmatpush3.bf16.msra.mxu1 %v1472_v5 }
  0x42   :  { %975 = vmatmul.mubr.bf16.vlgmr.msra.gmra.mrb[4].mxu0 %v1152_v7  ;;  %1370 = vmatprep.subr.bf16.mxu1 %v1479_v14 }
  0x43   :  { %1349 = vmatpush3.bf16.msra.mxu0 %v1478_v13  ;;  %1054 = vmatprep.mubr.bf16.mxu0 %v1157_v47 }
  0x44   :  { %1015 = vmatmul.mubr.bf16.vlgmr.msra.gmra.mrb[4].mxu1 %v1154_v11  ;;  %1350 = vmatprep.subr.bf16.mxu0 %v1481_v16 }
  0x45   :  { %1371 = vmatpush3.bf16.msra.mxu1 %v1480_v15  ;;  %1094 = vmatprep.mubr.bf16.mxu1 %v1159_v49 }
  0x46   :  { %1372 = vmatprep.subr.bf16.mxu1 %v1483_v18 }
  0x47   :  { %1351 = vmatpush3.bf16.msra.mxu0 %v1482_v17 }
  0x48   :  { %1352 = vmatprep.subr.bf16.mxu0 %v1485_v20 }
  0x49   :  { %1373 = vmatpush3.bf16.msra.mxu1 %v1484_v19 }
  0x4a   :  { %1374 = vmatprep.subr.bf16.mxu1 %v1487_v22 }
  0x4b   :  { %1353 = vmatpush3.bf16.msra.mxu0 %v1486_v21 }
  0x4c   :  { %1354 = vmatprep.subr.bf16.mxu0 %v1489_v24 }
  0x4d   :  { %1375 = vmatpush3.bf16.msra.mxu1 %v1488_v23 }
  0x4e   :  { %1376 = vmatprep.subr.bf16.mxu1 %v1491_v26 }
  0x4f   :  { %1355 = vmatpush3.bf16.msra.mxu0 %v1490_v25 }
  0x50   :  { %1356 = vmatprep.subr.bf16.mxu0 %v1493_v28 }
  0x51   :  { %1377 = vmatpush3.bf16.msra.mxu1 %v1492_v27 }
  0x52   :  { %1378 = vmatprep.subr.bf16.mxu1 %v1495_v30 }
  0x53   :  { %1357 = vmatpush3.bf16.msra.mxu0 %v1494_v29 }
  0x54   :  { %1358 = vmatprep.subr.bf16.mxu0 %v1497_v32 }
  0x55   :  { %1379 = vmatpush3.bf16.msra.mxu1 %v1496_v31 }
  0x56   :  { %1380 = vmatprep.subr.bf16.mxu1 %v1499_v34 }
  0x57   :  { %1359 = vmatpush3.bf16.msra.mxu0 %v1498_v33 }
  0x58   :  { %1360 = vmatprep.subr.bf16.mxu0 %v1501_v36 }
  0x59   :  { %1381 = vmatpush3.bf16.msra.mxu1 %v1500_v35 }
  0x5a   :  { %1382 = vmatprep.subr.bf16.mxu1 %v1503_v38 }
  0x5b   :  { %1361 = vmatpush3.bf16.msra.mxu0 %v1502_v37 }
  0x5c   :  { %1362 = vmatprep.subr.bf16.mxu0 %v1505_v40 }
  0x5d   :  { %1383 = vmatpush3.bf16.msra.mxu1 %v1504_v39 }
  0x5e   :  { %1384 = vmatprep.subr.bf16.mxu1 %v1507_v42 }
  0x5f   :  { %1363 = vmatpush3.bf16.msra.mxu0 %v1506_v41 }
  0x60   :  { %1395 = vmatprep.subr.bf16.mxu0 %v1516_v51 }
  0x61   :  { %1385 = vmatpush3.bf16.msra.mxu1 %v1508_v43 }
  0x62   :  { %1055 = vmatmul.mubr.bf16.vlgmr.msra.gmra.mrb[8].mxu0 %v1156_v46 }
  0x63   :  { %1396 = vmatpush3.bf16.msra.mxu0 %v1513_v50  ;;  %1399 = vmatprep.mubr.msk.bf16.mxu0 %vm1517_vm0, %v1516_v51 }
  0x64   :  { %1095 = vmatmul.mubr.bf16.vlgmr.msra.gmra.mrb[8].mxu1 %v1158_v48  ;;  %1397 = vmatprep.subr.bf16.mxu0 %v1516_v51 }
  0x67   :  { %1398 = vmatpush3.bf16.msra.mxu0 %v1514_v52 }
  0x6a   :  { %1400 = vmatmul.mubr.msk.bf16.vlgmr.msra.gmra.mrb[12].mxu0 %vm858_vm1, %v1515_v53 }
  0xf5   :  { %v1276_v54 = vpop.f32.mrb[0].mxu0 }
  0xf6   :  { %v1277_v56 = vpop.f32.mrb[1].mxu0 }
  0xf7   :  { %v1278_v57 = vadd.f32 %v1277_v56, %v1276_v54  ;;  %v1279_v58 = vpop.f32.mrb[2].mxu0  ;;  %v1298_v59 = vpop.f32.mrb[0].mxu1 }
  0xf8   :  { %v1280_v60 = vpop.f32.mrb[3].mxu0  ;;  %v1299_v61 = vpop.f32.mrb[1].mxu1 }
  0xf9   :  { %v897_v62 = vadd.f32 %v1278_v57, %v1147_v55  ;;  %v1300_v63 = vadd.f32 %v1299_v61, %v1298_v59  ;;  %v1301_v0 = vpop.f32.mrb[2].mxu1 }
  0xfa   :  { %v1302_v1 = vpop.f32.mrb[3].mxu1 }
  0xfb   :  { %v937_v2 = vadd.f32 %v1300_v63, %v897_v62 }
 0x115   :  { %v1320_v3 = vpop.f32.mrb[4].mxu0 }
 0x116   :  { %v1321_v4 = vpop.f32.mrb[5].mxu0 }
 0x117   :  { %v1322_v5 = vadd.f32 %v1321_v4, %v1320_v3  ;;  %v1323_v6 = vpop.f32.mrb[6].mxu0  ;;  %v1342_v7 = vpop.f32.mrb[4].mxu1 }
 0x118   :  { %v1324_v8 = vpop.f32.mrb[7].mxu0  ;;  %v1343_v9 = vpop.f32.mrb[5].mxu1 }
 0x119   :  { %v977_v10 = vadd.f32 %v1322_v5, %v937_v2  ;;  %v1344_v11 = vadd.f32 %v1343_v9, %v1342_v7  ;;  %v1345_v12 = vpop.f32.mrb[6].mxu1 }
 0x11a   :  { %v1346_v13 = vpop.f32.mrb[7].mxu1 }
 0x11b   :  { %v1017_v14 = vadd.f32 %v1344_v11, %v977_v10 }
 0x135   :  { %v1364_v15 = vpop.f32.mrb[8].mxu0 }
 0x136   :  { %v1365_v16 = vpop.f32.mrb[9].mxu0 }
 0x137   :  { %v1386_v17 = vpop.f32.mrb[8].mxu1  ;;  %v1366_v18 = vadd.f32 %v1365_v16, %v1364_v15  ;;  %v1367_v19 = vpop.f32.mrb[10].mxu0 }
 0x138   :  { %v1387_v20 = vpop.f32.mrb[9].mxu1  ;;  %v1368_v22 = vpop.f32.mrb[11].mxu0 }
 0x139   :  { %v1388_v21 = vadd.f32 %v1387_v20, %v1386_v17  ;;  %v1389_v23 = vpop.f32.mrb[10].mxu1  ;;  %v1057_v24 = vadd.f32 %v1366_v18, %v1017_v14 }
 0x13a   :  { %v1390_v25 = vpop.f32.mrb[11].mxu1 }
 0x13b   :  { %v1097_v26 = vadd.f32 %v1388_v21, %v1057_v24 }
 0x13d   :  { %v1136_v27 = vpop.f32.mrb[12].mxu0 }
 0x13e   :  { %v1137_v28 = vadd.f32 %v1136_v27, %v1097_v26  ;;  %v1401_v29 = vpop.f32.mrb[13].mxu0 }
 0x13f   :  { %v1139_v30 = vpop.f32.mrb[14].mxu0 }
 0x140   :  { %1142 = vst [vmem:[%s1862_s3] sm:$0xff] %v1137_v28  ;;  %v1402_v31 = vpop.f32.mrb[15].mxu0 }

</bundles_post_ra>
